<compile_context>
chip_gen: v6e
topology: v6e:2x2x1
jax: 0.10.0
libtpu: 0.0.40
codegen_flags: <defaults>
</compile_context>

<pallas_src>
import jax
import jax.numpy as jnp
from jax.experimental import pallas as pl
from jax.experimental.pallas import tpu as pltpu


def dgcnn_kernel(x_ref, a_ref, p_ref,
                 w1_ref, b1_ref, wk_ref, bk_ref,
                 fc1w_ref, fc1b_ref, fc2w_ref, fc2b_ref,
                 out_ref):
    f32 = jnp.float32
    bf16 = jnp.bfloat16

    A = a_ref[...]                     # [NB, NB] bf16 (diagonal block of A_norm)
    x = x_ref[...]                     # [NB, 1]  f32

    # --- GCNConv 1: relu(A @ (x @ W1) + b1) ---------------------------------
    # input_feat == 1 -> x @ W1 is an outer product: VPU broadcast multiply,
    # no MXU pass with a padded K.
    xw = x * w1_ref[...]               # [NB,1] * [1,32] -> [NB,32] (f32, VPU)
    h = jnp.dot(A, xw.astype(bf16), preferred_element_type=f32) + b1_ref[...]
    h = jnp.maximum(h, 0.0)            # [NB, 32] f32

    # Folded pooling + fc1 (linearity):
    #   cat_i(P @ h_i) @ W_fc1 == P @ (sum_i h_i @ W_fc1_slice_i)
    acc = jnp.dot(h.astype(bf16), fc1w_ref[0],
                  preferred_element_type=f32)          # [NB, 128] f32, lane-dense

    # --- GCNConv 2..6 (unrolled) --------------------------------------------
    for i in range(5):
        hw = jnp.dot(h.astype(bf16), wk_ref[i], preferred_element_type=f32)
        h = jnp.dot(A, hw.astype(bf16), preferred_element_type=f32) + bk_ref[i]
        h = jnp.maximum(h, 0.0)
        acc = acc + jnp.dot(h.astype(bf16), fc1w_ref[i + 1],
                            preferred_element_type=f32)

    # --- global_add_pool folded into fc1: z = relu(P @ acc + fc1b) ----------
    z = jnp.dot(p_ref[...], acc.astype(bf16),
                preferred_element_type=f32) + fc1b_ref[...]      # [GB, 128]
    z = jnp.maximum(z, 0.0)

    # dropout(p=0.2) is the identity at inference (training=False)

    # --- fc2 + softmax(dim=1) -------------------------------------------------
    logits = jnp.dot(z.astype(bf16), fc2w_ref[...],
                     preferred_element_type=f32) + fc2b_ref[...]  # [GB, 2]
    m = jnp.max(logits, axis=1, keepdims=True)
    e = jnp.exp(logits - m)
    inv = pl.reciprocal(jnp.sum(e, axis=1, keepdims=True), approx=True)
    out_ref[...] = e * inv


def dgcnn_forward(x, a_norm, pool_mat, params, *, nodes_per_block, graphs_per_block):
    """x:[N,1] f32, a_norm:[N,N] f32 (block-diagonal across node blocks),
    pool_mat:[B,N] f32.  Grid is parallel over diagonal node/graph blocks."""
    (w1, b1, wk, bk, fc1w_stack, fc1b, fc2w, fc2b) = params
    N = x.shape[0]
    B = pool_mat.shape[0]
    out_feat = fc2w.shape[1]
    NB, GB = nodes_per_block, graphs_per_block
    num_blocks = N // NB
    assert N % NB == 0 and B % GB == 0 and B // GB == num_blocks

    a_bf = a_norm.astype(jnp.bfloat16)      # bf16 MXU operand; halves A's VMEM
    p_bf = pool_mat.astype(jnp.bfloat16)    # one-hot -> exact in bf16

    in_specs = [
        pl.BlockSpec((NB, 1), lambda i: (i, 0)),          # x row block
        pl.BlockSpec((NB, NB), lambda i: (i, i)),         # diagonal A block
        pl.BlockSpec((GB, NB), lambda i: (i, i)),         # P block (graphs x nodes)
        pl.BlockSpec(w1.shape, lambda i: (0, 0)),
        pl.BlockSpec(b1.shape, lambda i: (0, 0)),
        pl.BlockSpec(wk.shape, lambda i: (0, 0, 0)),
        pl.BlockSpec(bk.shape, lambda i: (0, 0, 0)),
        pl.BlockSpec(fc1w_stack.shape, lambda i: (0, 0, 0)),
        pl.BlockSpec(fc1b.shape, lambda i: (0, 0)),
        pl.BlockSpec(fc2w.shape, lambda i: (0, 0)),
        pl.BlockSpec(fc2b.shape, lambda i: (0, 0)),
    ]
    out_spec = pl.BlockSpec((GB, out_feat), lambda i: (i, 0))

    return pl.pallas_call(
        dgcnn_kernel,
        out_shape=jax.ShapeDtypeStruct((B, out_feat), jnp.float32),
        grid=(num_blocks,),
        in_specs=in_specs,
        out_specs=out_spec,
        compiler_params=pltpu.CompilerParams(
            dimension_semantics=("parallel",)),   # uses both TCs on v7x
    )(x, a_bf, p_bf, w1, b1, wk, bk, fc1w_stack, fc1b, fc2w, fc2b)


# ----------------------- plain-JAX glue -----------------------

def build_gcn_norm_adj(edge_index, num_nodes):
    """Dense D^{-1/2}(A+I)D^{-1/2} from edge_index [2, E] (src, dst)."""
    src, dst = edge_index[0], edge_index[1]
    A = jnp.zeros((num_nodes, num_nodes), jnp.float32)
    A = A.at[dst, src].add(1.0)                    # message src -> dst
    A = A + jnp.eye(num_nodes, dtype=jnp.float32)  # self loops
    deg = jnp.sum(A, axis=1)
    dinv = jnp.where(deg > 0, 1.0 / jnp.sqrt(deg), 0.0)
    return dinv[:, None] * A * dinv[None, :]


def build_pool_matrix(batch, num_graphs):
    """[B, N] one-hot assignment so that P @ H == global_add_pool(H, batch)."""
    return (batch[None, :] == jnp.arange(num_graphs)[:, None]).astype(jnp.float32)


def init_params(key, hidden=32, output_feat=2):
    ks = jax.random.split(key, 8)
    scale = 0.1
    f32, bf16 = jnp.float32, jnp.bfloat16
    w1 = scale * jax.random.normal(ks[0], (1, hidden), f32)            # input_feat=1
    b1 = scale * jax.random.normal(ks[1], (1, hidden), f32)
    wk = (scale * jax.random.normal(ks[2], (5, hidden, hidden), f32)).astype(bf16)
    bk = scale * jax.random.normal(ks[3], (5, 1, hidden), f32)
    fc1w = (scale * jax.random.normal(ks[4], (6 * hidden, 128), f32)).astype(bf16)
    fc1b = scale * jax.random.normal(ks[5], (1, 128), f32)
    fc2w = (scale * jax.random.normal(ks[6], (128, output_feat), f32)).astype(bf16)
    fc2b = scale * jax.random.normal(ks[7], (1, output_feat), f32)
    fc1w_stack = fc1w.reshape(6, hidden, 128)   # slice i == fc1w[i*32:(i+1)*32, :]
    return (w1, b1, wk, bk, fc1w_stack, fc1b, fc2w, fc2b)


def dgcnn_reference(x, a_norm, pool_mat, params):
    """Pure-JAX f32 reference with the original concat structure."""
    (w1, b1, wk, bk, fc1w_stack, fc1b, fc2w, fc2b) = params
    f32 = jnp.float32
    A = a_norm.astype(jnp.bfloat16).astype(f32)   # same rounded A as the kernel
    h = x @ w1
    h = jnp.maximum(A @ h + b1, 0.0)
    pooled = [pool_mat @ h]
    for i in range(5):
        h = jnp.maximum(A @ (h @ wk[i].astype(f32)) + bk[i], 0.0)
        pooled.append(pool_mat @ h)
    feat = jnp.concatenate(pooled, axis=1)                        # [B, 192]
    fc1w = fc1w_stack.astype(f32).reshape(192, 128)
    z = jnp.maximum(feat @ fc1w + fc1b, 0.0)
    logits = z @ fc2w.astype(f32) + fc2b
    return jax.nn.softmax(logits, axis=1)


if __name__ == "__main__":
    key = jax.random.PRNGKey(0)
    k_x, k_p = jax.random.split(key)

    N_PER_GRAPH = 8
    GRAPHS_PER_BLOCK = 16                      # -> 128 nodes per block (lane-aligned)
    NUM_BLOCKS = 2                             # parallel grid axis
    NUM_GRAPHS = GRAPHS_PER_BLOCK * NUM_BLOCKS  # 32 graphs per pallas_call
    N = N_PER_GRAPH * NUM_GRAPHS               # 256 nodes
    NB = N_PER_GRAPH * GRAPHS_PER_BLOCK        # 128 nodes per block
    OUTPUT_FEAT = 2

    # Node features x: [N, 1] (input_feat = 1).
    x = jax.random.normal(k_x, (N, 1), jnp.float32)

    # Edge index: bidirectional ring within each graph (batch is sorted, so the
    # dense adjacency is block-diagonal across node blocks).
    src_list, dst_list = [], []
    for g in range(NUM_GRAPHS):
        base = g * N_PER_GRAPH
        for i in range(N_PER_GRAPH):
            a = base + i
            b = base + (i + 1) % N_PER_GRAPH
            src_list += [a, b]
            dst_list += [b, a]
    edge_index = jnp.array([src_list, dst_list], dtype=jnp.int32)

    batch = jnp.repeat(jnp.arange(NUM_GRAPHS, dtype=jnp.int32), N_PER_GRAPH)

    a_norm = build_gcn_norm_adj(edge_index, N)
    pool_mat = build_pool_matrix(batch, NUM_GRAPHS)
    params = init_params(k_p, hidden=32, output_feat=OUTPUT_FEAT)

    out = dgcnn_forward(x, a_norm, pool_mat, params,
                        nodes_per_block=NB, graphs_per_block=GRAPHS_PER_BLOCK)
    out = jax.block_until_ready(out)

    assert out.shape == (NUM_GRAPHS, OUTPUT_FEAT)
    # Softmax rows sum to ~1 (approx-reciprocal denom -> loose tolerance).
    assert bool(jnp.all(jnp.abs(jnp.sum(out, axis=1) - 1.0) < 1e-2))
    # Match the unfused f32 reference within bf16 noise.
    ref = dgcnn_reference(x, a_norm, pool_mat, params)
    assert bool(jnp.max(jnp.abs(out - ref)) < 5e-2)
    print("KERNEL_OK")
</pallas_src>

<mosaic_0001>
module attributes {stable_mosaic.version = 11 : i64} {
  func.func @dgcnn_kernel(%arg0: i32, %arg1: memref<128x1xf32, #tpu.memory_space<vmem>>, %arg2: memref<128x128xbf16, #tpu.memory_space<vmem>>, %arg3: memref<16x128xbf16, #tpu.memory_space<vmem>>, %arg4: memref<1x32xf32, #tpu.memory_space<vmem>>, %arg5: memref<1x32xf32, #tpu.memory_space<vmem>>, %arg6: memref<5x32x32xbf16, #tpu.memory_space<vmem>>, %arg7: memref<5x1x32xf32, #tpu.memory_space<vmem>>, %arg8: memref<6x32x128xbf16, #tpu.memory_space<vmem>>, %arg9: memref<1x128xf32, #tpu.memory_space<vmem>>, %arg10: memref<128x2xbf16, #tpu.memory_space<vmem>>, %arg11: memref<1x2xf32, #tpu.memory_space<vmem>>, %arg12: memref<16x2xf32, #tpu.memory_space<vmem>>) attributes {dimension_semantics = [#tpu.dimension_semantics<parallel>], iteration_bounds = array<i64: 2>, scalar_prefetch = 0 : i64, scratch_operands = 0 : i64, tpu.core_type = #tpu.core_type<tc>, window_params = [{transform_indices = @transform_0, window_bounds = array<i64: 128, 1>}, {transform_indices = @transform_1, window_bounds = array<i64: 128, 128>}, {transform_indices = @transform_2, window_bounds = array<i64: 16, 128>}, {pipeline_mode = #tpu.pipeline_mode<synchronous>, transform_indices = @transform_3, window_bounds = array<i64: 1, 32>}, {pipeline_mode = #tpu.pipeline_mode<synchronous>, transform_indices = @transform_4, window_bounds = array<i64: 1, 32>}, {pipeline_mode = #tpu.pipeline_mode<synchronous>, transform_indices = @transform_5, window_bounds = array<i64: 5, 32, 32>}, {pipeline_mode = #tpu.pipeline_mode<synchronous>, transform_indices = @transform_6, window_bounds = array<i64: 5, 1, 32>}, {pipeline_mode = #tpu.pipeline_mode<synchronous>, transform_indices = @transform_7, window_bounds = array<i64: 6, 32, 128>}, {pipeline_mode = #tpu.pipeline_mode<synchronous>, transform_indices = @transform_8, window_bounds = array<i64: 1, 128>}, {pipeline_mode = #tpu.pipeline_mode<synchronous>, transform_indices = @transform_9, window_bounds = array<i64: 128, 2>}, {pipeline_mode = #tpu.pipeline_mode<synchronous>, transform_indices = @transform_10, window_bounds = array<i64: 1, 2>}, {transform_indices = @transform_11, window_bounds = array<i64: 16, 2>}]} {
    %c0 = arith.constant 0 : index
    %c0_0 = arith.constant 0 : index
    %0 = vector.load %arg2[%c0, %c0_0] : memref<128x128xbf16, #tpu.memory_space<vmem>>, vector<128x128xbf16>
    %c0_1 = arith.constant 0 : index
    %c0_2 = arith.constant 0 : index
    %1 = vector.load %arg1[%c0_1, %c0_2] : memref<128x1xf32, #tpu.memory_space<vmem>>, vector<128x1xf32>
    %c0_3 = arith.constant 0 : index
    %c0_4 = arith.constant 0 : index
    %2 = vector.load %arg4[%c0_3, %c0_4] : memref<1x32xf32, #tpu.memory_space<vmem>>, vector<1x32xf32>
    %3 = vector.broadcast %1 : vector<128x1xf32> to vector<128x32xf32>
    %4 = vector.broadcast %2 : vector<1x32xf32> to vector<128x32xf32>
    %5 = arith.mulf %3, %4 : vector<128x32xf32>
    %6 = arith.truncf %5 : vector<128x32xf32> to vector<128x32xbf16>
    %cst = arith.constant dense<0.000000e+00> : vector<128x32xf32>
    %7 = tpu.matmul %0, %6, %cst {dimension_numbers = #tpu.dot_dimension_numbers<[1], [0], [0], [1], [0, 0, 1, 1], [], []>} : vector<128x128xbf16>, vector<128x32xbf16>, vector<128x32xf32> -> vector<128x32xf32>
    %c0_5 = arith.constant 0 : index
    %c0_6 = arith.constant 0 : index
    %8 = vector.load %arg5[%c0_5, %c0_6] : memref<1x32xf32, #tpu.memory_space<vmem>>, vector<1x32xf32>
    %9 = vector.broadcast %8 : vector<1x32xf32> to vector<128x32xf32>
    %10 = arith.addf %7, %9 : vector<128x32xf32>
    %cst_7 = arith.constant 0.000000e+00 : f32
    %11 = vector.broadcast %cst_7 : f32 to vector<128x32xf32>
    %12 = arith.maximumf %10, %11 : vector<128x32xf32>
    %13 = arith.truncf %12 : vector<128x32xf32> to vector<128x32xbf16>
    %c0_8 = arith.constant 0 : index
    %c0_9 = arith.constant 0 : index
    %c0_10 = arith.constant 0 : index
    %14 = vector.load %arg8[%c0_8, %c0_9, %c0_10] : memref<6x32x128xbf16, #tpu.memory_space<vmem>>, vector<1x32x128xbf16>
    %15 = vector.shape_cast %14 : vector<1x32x128xbf16> to vector<32x128xbf16>
    %cst_11 = arith.constant dense<0.000000e+00> : vector<128x128xf32>
    %16 = tpu.matmul %13, %15, %cst_11 {dimension_numbers = #tpu.dot_dimension_numbers<[1], [0], [0], [1], [0, 0, 1, 1], [], []>} : vector<128x32xbf16>, vector<32x128xbf16>, vector<128x128xf32> -> vector<128x128xf32>
    %17 = arith.truncf %12 : vector<128x32xf32> to vector<128x32xbf16>
    %c0_12 = arith.constant 0 : index
    %c0_13 = arith.constant 0 : index
    %c0_14 = arith.constant 0 : index
    %18 = vector.load %arg6[%c0_12, %c0_13, %c0_14] : memref<5x32x32xbf16, #tpu.memory_space<vmem>>, vector<1x32x32xbf16>
    %19 = vector.shape_cast %18 : vector<1x32x32xbf16> to vector<32x32xbf16>
    %cst_15 = arith.constant dense<0.000000e+00> : vector<128x32xf32>
    %20 = tpu.matmul %17, %19, %cst_15 {dimension_numbers = #tpu.dot_dimension_numbers<[1], [0], [0], [1], [0, 0, 1, 1], [], []>} : vector<128x32xbf16>, vector<32x32xbf16>, vector<128x32xf32> -> vector<128x32xf32>
    %21 = arith.truncf %20 : vector<128x32xf32> to vector<128x32xbf16>
    %cst_16 = arith.constant dense<0.000000e+00> : vector<128x32xf32>
    %22 = tpu.matmul %0, %21, %cst_16 {dimension_numbers = #tpu.dot_dimension_numbers<[1], [0], [0], [1], [0, 0, 1, 1], [], []>} : vector<128x128xbf16>, vector<128x32xbf16>, vector<128x32xf32> -> vector<128x32xf32>
    %c0_17 = arith.constant 0 : index
    %c0_18 = arith.constant 0 : index
    %c0_19 = arith.constant 0 : index
    %23 = vector.load %arg7[%c0_17, %c0_18, %c0_19] : memref<5x1x32xf32, #tpu.memory_space<vmem>>, vector<1x1x32xf32>
    %24 = vector.shape_cast %23 : vector<1x1x32xf32> to vector<1x32xf32>
    %25 = vector.broadcast %24 : vector<1x32xf32> to vector<128x32xf32>
    %26 = arith.addf %22, %25 : vector<128x32xf32>
    %cst_20 = arith.constant 0.000000e+00 : f32
    %27 = vector.broadcast %cst_20 : f32 to vector<128x32xf32>
    %28 = arith.maximumf %26, %27 : vector<128x32xf32>
    %29 = arith.truncf %28 : vector<128x32xf32> to vector<128x32xbf16>
    %c1 = arith.constant 1 : index
    %c0_21 = arith.constant 0 : index
    %c0_22 = arith.constant 0 : index
    %30 = vector.load %arg8[%c1, %c0_21, %c0_22] : memref<6x32x128xbf16, #tpu.memory_space<vmem>>, vector<1x32x128xbf16>
    %31 = vector.shape_cast %30 : vector<1x32x128xbf16> to vector<32x128xbf16>
    %cst_23 = arith.constant dense<0.000000e+00> : vector<128x128xf32>
    %32 = tpu.matmul %29, %31, %cst_23 {dimension_numbers = #tpu.dot_dimension_numbers<[1], [0], [0], [1], [0, 0, 1, 1], [], []>} : vector<128x32xbf16>, vector<32x128xbf16>, vector<128x128xf32> -> vector<128x128xf32>
    %33 = arith.addf %16, %32 : vector<128x128xf32>
    %34 = arith.truncf %28 : vector<128x32xf32> to vector<128x32xbf16>
    %c1_24 = arith.constant 1 : index
    %c0_25 = arith.constant 0 : index
    %c0_26 = arith.constant 0 : index
    %35 = vector.load %arg6[%c1_24, %c0_25, %c0_26] : memref<5x32x32xbf16, #tpu.memory_space<vmem>>, vector<1x32x32xbf16>
    %36 = vector.shape_cast %35 : vector<1x32x32xbf16> to vector<32x32xbf16>
    %cst_27 = arith.constant dense<0.000000e+00> : vector<128x32xf32>
    %37 = tpu.matmul %34, %36, %cst_27 {dimension_numbers = #tpu.dot_dimension_numbers<[1], [0], [0], [1], [0, 0, 1, 1], [], []>} : vector<128x32xbf16>, vector<32x32xbf16>, vector<128x32xf32> -> vector<128x32xf32>
    %38 = arith.truncf %37 : vector<128x32xf32> to vector<128x32xbf16>
    %cst_28 = arith.constant dense<0.000000e+00> : vector<128x32xf32>
    %39 = tpu.matmul %0, %38, %cst_28 {dimension_numbers = #tpu.dot_dimension_numbers<[1], [0], [0], [1], [0, 0, 1, 1], [], []>} : vector<128x128xbf16>, vector<128x32xbf16>, vector<128x32xf32> -> vector<128x32xf32>
    %c1_29 = arith.constant 1 : index
    %c0_30 = arith.constant 0 : index
    %c0_31 = arith.constant 0 : index
    %40 = vector.load %arg7[%c1_29, %c0_30, %c0_31] : memref<5x1x32xf32, #tpu.memory_space<vmem>>, vector<1x1x32xf32>
    %41 = vector.shape_cast %40 : vector<1x1x32xf32> to vector<1x32xf32>
    %42 = vector.broadcast %41 : vector<1x32xf32> to vector<128x32xf32>
    %43 = arith.addf %39, %42 : vector<128x32xf32>
    %cst_32 = arith.constant 0.000000e+00 : f32
    %44 = vector.broadcast %cst_32 : f32 to vector<128x32xf32>
    %45 = arith.maximumf %43, %44 : vector<128x32xf32>
    %46 = arith.truncf %45 : vector<128x32xf32> to vector<128x32xbf16>
    %c2 = arith.constant 2 : index
    %c0_33 = arith.constant 0 : index
    %c0_34 = arith.constant 0 : index
    %47 = vector.load %arg8[%c2, %c0_33, %c0_34] : memref<6x32x128xbf16, #tpu.memory_space<vmem>>, vector<1x32x128xbf16>
    %48 = vector.shape_cast %47 : vector<1x32x128xbf16> to vector<32x128xbf16>
    %cst_35 = arith.constant dense<0.000000e+00> : vector<128x128xf32>
    %49 = tpu.matmul %46, %48, %cst_35 {dimension_numbers = #tpu.dot_dimension_numbers<[1], [0], [0], [1], [0, 0, 1, 1], [], []>} : vector<128x32xbf16>, vector<32x128xbf16>, vector<128x128xf32> -> vector<128x128xf32>
    %50 = arith.addf %33, %49 : vector<128x128xf32>
    %51 = arith.truncf %45 : vector<128x32xf32> to vector<128x32xbf16>
    %c2_36 = arith.constant 2 : index
    %c0_37 = arith.constant 0 : index
    %c0_38 = arith.constant 0 : index
    %52 = vector.load %arg6[%c2_36, %c0_37, %c0_38] : memref<5x32x32xbf16, #tpu.memory_space<vmem>>, vector<1x32x32xbf16>
    %53 = vector.shape_cast %52 : vector<1x32x32xbf16> to vector<32x32xbf16>
    %cst_39 = arith.constant dense<0.000000e+00> : vector<128x32xf32>
    %54 = tpu.matmul %51, %53, %cst_39 {dimension_numbers = #tpu.dot_dimension_numbers<[1], [0], [0], [1], [0, 0, 1, 1], [], []>} : vector<128x32xbf16>, vector<32x32xbf16>, vector<128x32xf32> -> vector<128x32xf32>
    %55 = arith.truncf %54 : vector<128x32xf32> to vector<128x32xbf16>
    %cst_40 = arith.constant dense<0.000000e+00> : vector<128x32xf32>
    %56 = tpu.matmul %0, %55, %cst_40 {dimension_numbers = #tpu.dot_dimension_numbers<[1], [0], [0], [1], [0, 0, 1, 1], [], []>} : vector<128x128xbf16>, vector<128x32xbf16>, vector<128x32xf32> -> vector<128x32xf32>
    %c2_41 = arith.constant 2 : index
    %c0_42 = arith.constant 0 : index
    %c0_43 = arith.constant 0 : index
    %57 = vector.load %arg7[%c2_41, %c0_42, %c0_43] : memref<5x1x32xf32, #tpu.memory_space<vmem>>, vector<1x1x32xf32>
    %58 = vector.shape_cast %57 : vector<1x1x32xf32> to vector<1x32xf32>
    %59 = vector.broadcast %58 : vector<1x32xf32> to vector<128x32xf32>
    %60 = arith.addf %56, %59 : vector<128x32xf32>
    %cst_44 = arith.constant 0.000000e+00 : f32
    %61 = vector.broadcast %cst_44 : f32 to vector<128x32xf32>
    %62 = arith.maximumf %60, %61 : vector<128x32xf32>
    %63 = arith.truncf %62 : vector<128x32xf32> to vector<128x32xbf16>
    %c3 = arith.constant 3 : index
    %c0_45 = arith.constant 0 : index
    %c0_46 = arith.constant 0 : index
    %64 = vector.load %arg8[%c3, %c0_45, %c0_46] : memref<6x32x128xbf16, #tpu.memory_space<vmem>>, vector<1x32x128xbf16>
    %65 = vector.shape_cast %64 : vector<1x32x128xbf16> to vector<32x128xbf16>
    %cst_47 = arith.constant dense<0.000000e+00> : vector<128x128xf32>
    %66 = tpu.matmul %63, %65, %cst_47 {dimension_numbers = #tpu.dot_dimension_numbers<[1], [0], [0], [1], [0, 0, 1, 1], [], []>} : vector<128x32xbf16>, vector<32x128xbf16>, vector<128x128xf32> -> vector<128x128xf32>
    %67 = arith.addf %50, %66 : vector<128x128xf32>
    %68 = arith.truncf %62 : vector<128x32xf32> to vector<128x32xbf16>
    %c3_48 = arith.constant 3 : index
    %c0_49 = arith.constant 0 : index
    %c0_50 = arith.constant 0 : index
    %69 = vector.load %arg6[%c3_48, %c0_49, %c0_50] : memref<5x32x32xbf16, #tpu.memory_space<vmem>>, vector<1x32x32xbf16>
    %70 = vector.shape_cast %69 : vector<1x32x32xbf16> to vector<32x32xbf16>
    %cst_51 = arith.constant dense<0.000000e+00> : vector<128x32xf32>
    %71 = tpu.matmul %68, %70, %cst_51 {dimension_numbers = #tpu.dot_dimension_numbers<[1], [0], [0], [1], [0, 0, 1, 1], [], []>} : vector<128x32xbf16>, vector<32x32xbf16>, vector<128x32xf32> -> vector<128x32xf32>
    %72 = arith.truncf %71 : vector<128x32xf32> to vector<128x32xbf16>
    %cst_52 = arith.constant dense<0.000000e+00> : vector<128x32xf32>
    %73 = tpu.matmul %0, %72, %cst_52 {dimension_numbers = #tpu.dot_dimension_numbers<[1], [0], [0], [1], [0, 0, 1, 1], [], []>} : vector<128x128xbf16>, vector<128x32xbf16>, vector<128x32xf32> -> vector<128x32xf32>
    %c3_53 = arith.constant 3 : index
    %c0_54 = arith.constant 0 : index
    %c0_55 = arith.constant 0 : index
    %74 = vector.load %arg7[%c3_53, %c0_54, %c0_55] : memref<5x1x32xf32, #tpu.memory_space<vmem>>, vector<1x1x32xf32>
    %75 = vector.shape_cast %74 : vector<1x1x32xf32> to vector<1x32xf32>
    %76 = vector.broadcast %75 : vector<1x32xf32> to vector<128x32xf32>
    %77 = arith.addf %73, %76 : vector<128x32xf32>
    %cst_56 = arith.constant 0.000000e+00 : f32
    %78 = vector.broadcast %cst_56 : f32 to vector<128x32xf32>
    %79 = arith.maximumf %77, %78 : vector<128x32xf32>
    %80 = arith.truncf %79 : vector<128x32xf32> to vector<128x32xbf16>
    %c4 = arith.constant 4 : index
    %c0_57 = arith.constant 0 : index
    %c0_58 = arith.constant 0 : index
    %81 = vector.load %arg8[%c4, %c0_57, %c0_58] : memref<6x32x128xbf16, #tpu.memory_space<vmem>>, vector<1x32x128xbf16>
    %82 = vector.shape_cast %81 : vector<1x32x128xbf16> to vector<32x128xbf16>
    %cst_59 = arith.constant dense<0.000000e+00> : vector<128x128xf32>
    %83 = tpu.matmul %80, %82, %cst_59 {dimension_numbers = #tpu.dot_dimension_numbers<[1], [0], [0], [1], [0, 0, 1, 1], [], []>} : vector<128x32xbf16>, vector<32x128xbf16>, vector<128x128xf32> -> vector<128x128xf32>
    %84 = arith.addf %67, %83 : vector<128x128xf32>
    %85 = arith.truncf %79 : vector<128x32xf32> to vector<128x32xbf16>
    %c4_60 = arith.constant 4 : index
    %c0_61 = arith.constant 0 : index
    %c0_62 = arith.constant 0 : index
    %86 = vector.load %arg6[%c4_60, %c0_61, %c0_62] : memref<5x32x32xbf16, #tpu.memory_space<vmem>>, vector<1x32x32xbf16>
    %87 = vector.shape_cast %86 : vector<1x32x32xbf16> to vector<32x32xbf16>
    %cst_63 = arith.constant dense<0.000000e+00> : vector<128x32xf32>
    %88 = tpu.matmul %85, %87, %cst_63 {dimension_numbers = #tpu.dot_dimension_numbers<[1], [0], [0], [1], [0, 0, 1, 1], [], []>} : vector<128x32xbf16>, vector<32x32xbf16>, vector<128x32xf32> -> vector<128x32xf32>
    %89 = arith.truncf %88 : vector<128x32xf32> to vector<128x32xbf16>
    %cst_64 = arith.constant dense<0.000000e+00> : vector<128x32xf32>
    %90 = tpu.matmul %0, %89, %cst_64 {dimension_numbers = #tpu.dot_dimension_numbers<[1], [0], [0], [1], [0, 0, 1, 1], [], []>} : vector<128x128xbf16>, vector<128x32xbf16>, vector<128x32xf32> -> vector<128x32xf32>
    %c4_65 = arith.constant 4 : index
    %c0_66 = arith.constant 0 : index
    %c0_67 = arith.constant 0 : index
    %91 = vector.load %arg7[%c4_65, %c0_66, %c0_67] : memref<5x1x32xf32, #tpu.memory_space<vmem>>, vector<1x1x32xf32>
    %92 = vector.shape_cast %91 : vector<1x1x32xf32> to vector<1x32xf32>
    %93 = vector.broadcast %92 : vector<1x32xf32> to vector<128x32xf32>
    %94 = arith.addf %90, %93 : vector<128x32xf32>
    %cst_68 = arith.constant 0.000000e+00 : f32
    %95 = vector.broadcast %cst_68 : f32 to vector<128x32xf32>
    %96 = arith.maximumf %94, %95 : vector<128x32xf32>
    %97 = arith.truncf %96 : vector<128x32xf32> to vector<128x32xbf16>
    %c5 = arith.constant 5 : index
    %c0_69 = arith.constant 0 : index
    %c0_70 = arith.constant 0 : index
    %98 = vector.load %arg8[%c5, %c0_69, %c0_70] : memref<6x32x128xbf16, #tpu.memory_space<vmem>>, vector<1x32x128xbf16>
    %99 = vector.shape_cast %98 : vector<1x32x128xbf16> to vector<32x128xbf16>
    %cst_71 = arith.constant dense<0.000000e+00> : vector<128x128xf32>
    %100 = tpu.matmul %97, %99, %cst_71 {dimension_numbers = #tpu.dot_dimension_numbers<[1], [0], [0], [1], [0, 0, 1, 1], [], []>} : vector<128x32xbf16>, vector<32x128xbf16>, vector<128x128xf32> -> vector<128x128xf32>
    %101 = arith.addf %84, %100 : vector<128x128xf32>
    %c0_72 = arith.constant 0 : index
    %c0_73 = arith.constant 0 : index
    %102 = vector.load %arg3[%c0_72, %c0_73] : memref<16x128xbf16, #tpu.memory_space<vmem>>, vector<16x128xbf16>
    %103 = arith.truncf %101 : vector<128x128xf32> to vector<128x128xbf16>
    %cst_74 = arith.constant dense<0.000000e+00> : vector<16x128xf32>
    %104 = tpu.matmul %102, %103, %cst_74 {dimension_numbers = #tpu.dot_dimension_numbers<[1], [0], [0], [1], [0, 0, 1, 1], [], []>} : vector<16x128xbf16>, vector<128x128xbf16>, vector<16x128xf32> -> vector<16x128xf32>
    %c0_75 = arith.constant 0 : index
    %c0_76 = arith.constant 0 : index
    %105 = vector.load %arg9[%c0_75, %c0_76] : memref<1x128xf32, #tpu.memory_space<vmem>>, vector<1x128xf32>
    %106 = vector.broadcast %105 : vector<1x128xf32> to vector<16x128xf32>
    %107 = arith.addf %104, %106 : vector<16x128xf32>
    %cst_77 = arith.constant 0.000000e+00 : f32
    %108 = vector.broadcast %cst_77 : f32 to vector<16x128xf32>
    %109 = arith.maximumf %107, %108 : vector<16x128xf32>
    %110 = arith.truncf %109 : vector<16x128xf32> to vector<16x128xbf16>
    %c0_78 = arith.constant 0 : index
    %c0_79 = arith.constant 0 : index
    %111 = vector.load %arg10[%c0_78, %c0_79] : memref<128x2xbf16, #tpu.memory_space<vmem>>, vector<128x2xbf16>
    %cst_80 = arith.constant dense<0.000000e+00> : vector<16x2xf32>
    %112 = tpu.matmul %110, %111, %cst_80 {dimension_numbers = #tpu.dot_dimension_numbers<[1], [0], [0], [1], [0, 0, 1, 1], [], []>} : vector<16x128xbf16>, vector<128x2xbf16>, vector<16x2xf32> -> vector<16x2xf32>
    %c0_81 = arith.constant 0 : index
    %c0_82 = arith.constant 0 : index
    %113 = vector.load %arg11[%c0_81, %c0_82] : memref<1x2xf32, #tpu.memory_space<vmem>>, vector<1x2xf32>
    %114 = vector.broadcast %113 : vector<1x2xf32> to vector<16x2xf32>
    %115 = arith.addf %112, %114 : vector<16x2xf32>
    %cst_83 = arith.constant dense<0xFF800000> : vector<16xf32>
    %116 = vector.multi_reduction <maximumf>, %115, %cst_83 [1] : vector<16x2xf32> to vector<16xf32>
    %117 = vector.shape_cast %116 : vector<16xf32> to vector<16x1xf32>
    %118 = vector.broadcast %117 : vector<16x1xf32> to vector<16x2xf32>
    %119 = arith.subf %115, %118 : vector<16x2xf32>
    %120 = math.exp %119 : vector<16x2xf32>
    %cst_84 = arith.constant dense<0.000000e+00> : vector<16xf32>
    %121 = vector.multi_reduction <add>, %120, %cst_84 [1] : vector<16x2xf32> to vector<16xf32>
    %122 = vector.shape_cast %121 : vector<16xf32> to vector<16x1xf32>
    %123 = tpu.reciprocal %122 {approx = true} : vector<16x1xf32> -> vector<16x1xf32>
    %124 = vector.broadcast %123 : vector<16x1xf32> to vector<16x2xf32>
    %125 = arith.mulf %120, %124 : vector<16x2xf32>
    %c0_85 = arith.constant 0 : index
    %c0_86 = arith.constant 0 : index
    %126 = vector.load %arg12[%c0_85, %c0_86] : memref<16x2xf32, #tpu.memory_space<vmem>>, vector<16x2xf32>
    tpu.vector_store %arg12[%c0_85, %c0_86], %125 {strides = array<i32>} : memref<16x2xf32, #tpu.memory_space<vmem>>, vector<16x2xf32>,
    return
  }
  func.func @transform_0(%arg0: i32) -> (i32, i32) {
    %c0_i32 = arith.constant 0 : i32
    %c0_i32_0 = arith.constant 0 : i32
    return %arg0, %c0_i32 : i32, i32
  }
  func.func @transform_1(%arg0: i32) -> (i32, i32) {
    %c0_i32 = arith.constant 0 : i32
    return %arg0, %arg0 : i32, i32
  }
  func.func @transform_2(%arg0: i32) -> (i32, i32) {
    %c0_i32 = arith.constant 0 : i32
    return %arg0, %arg0 : i32, i32
  }
  func.func @transform_3(%arg0: i32) -> (i32, i32) {
    %c0_i32 = arith.constant 0 : i32
    %c0_i32_0 = arith.constant 0 : i32
    %c0_i32_1 = arith.constant 0 : i32
    return %c0_i32, %c0_i32_0 : i32, i32
  }
  func.func @transform_4(%arg0: i32) -> (i32, i32) {
    %c0_i32 = arith.constant 0 : i32
    %c0_i32_0 = arith.constant 0 : i32
    %c0_i32_1 = arith.constant 0 : i32
    return %c0_i32, %c0_i32_0 : i32, i32
  }
  func.func @transform_5(%arg0: i32) -> (i32, i32, i32) {
    %c0_i32 = arith.constant 0 : i32
    %c0_i32_0 = arith.constant 0 : i32
    %c0_i32_1 = arith.constant 0 : i32
    %c0_i32_2 = arith.constant 0 : i32
    return %c0_i32, %c0_i32_0, %c0_i32_1 : i32, i32, i32
  }
  func.func @transform_6(%arg0: i32) -> (i32, i32, i32) {
    %c0_i32 = arith.constant 0 : i32
    %c0_i32_0 = arith.constant 0 : i32
    %c0_i32_1 = arith.constant 0 : i32
    %c0_i32_2 = arith.constant 0 : i32
    return %c0_i32, %c0_i32_0, %c0_i32_1 : i32, i32, i32
  }
  func.func @transform_7(%arg0: i32) -> (i32, i32, i32) {
    %c0_i32 = arith.constant 0 : i32
    %c0_i32_0 = arith.constant 0 : i32
    %c0_i32_1 = arith.constant 0 : i32
    %c0_i32_2 = arith.constant 0 : i32
    return %c0_i32, %c0_i32_0, %c0_i32_1 : i32, i32, i32
  }
  func.func @transform_8(%arg0: i32) -> (i32, i32) {
    %c0_i32 = arith.constant 0 : i32
    %c0_i32_0 = arith.constant 0 : i32
    %c0_i32_1 = arith.constant 0 : i32
    return %c0_i32, %c0_i32_0 : i32, i32
  }
  func.func @transform_9(%arg0: i32) -> (i32, i32) {
    %c0_i32 = arith.constant 0 : i32
    %c0_i32_0 = arith.constant 0 : i32
    %c0_i32_1 = arith.constant 0 : i32
    return %c0_i32, %c0_i32_0 : i32, i32
  }
  func.func @transform_10(%arg0: i32) -> (i32, i32) {
    %c0_i32 = arith.constant 0 : i32
    %c0_i32_0 = arith.constant 0 : i32
    %c0_i32_1 = arith.constant 0 : i32
    return %c0_i32, %c0_i32_0 : i32, i32
  }
  func.func @transform_11(%arg0: i32) -> (i32, i32) {
    %c0_i32 = arith.constant 0 : i32
    %c0_i32_0 = arith.constant 0 : i32
    return %arg0, %c0_i32 : i32, i32
  }
}

</mosaic_0001>

<bundles_post_ra>
// kernel: tpu_custom_call.1
= control target key start
LH: loop header
LB: loop body
LE: loop exit
PB: predicated region body
PF: predicated region fallthrough
CT: control target
= control target key end

     0   :  { %s5197_s0 = inlined_call_operand.vmem [shape: f32[256,1], index: 0, kind: input, shape index: {}]   ;;  %s5198_s1 = inlined_call_operand.vmem [shape: bf16[256,256], index: 1, kind: input, shape index: {}]   ;;  %s5199_s2 = inlined_call_operand.vmem [shape: bf16[32,256], index: 2, kind: input, shape index: {}]   ;;  %s5200_s3 = inlined_call_operand.vmem [shape: f32[1,32], index: 3, kind: input, shape index: {}]   ;;  %s5201_s4 = inlined_call_operand.vmem [shape: f32[1,32], index: 4, kind: input, shape index: {}]   ;;  %s5202_s5 = inlined_call_operand.hbm [shape: bf16[5,32,32], index: 5, kind: input, shape index: {}]   ;;  %s5203_s6 = inlined_call_operand.vmem [shape: f32[5,1,32], index: 6, kind: input, shape index: {}]   ;;  %s5204_s7 = inlined_call_operand.hbm [shape: bf16[6,32,128], index: 7, kind: input, shape index: {}]   ;;  %s5205_s8 = inlined_call_operand.vmem [shape: f32[1,128], index: 8, kind: input, shape index: {}]   ;;  %s5206_s9 = inlined_call_operand.vmem [shape: bf16[128,2], index: 9, kind: input, shape index: {}]   ;;  %s5207_s10 = inlined_call_operand.vmem [shape: f32[1,2], index: 10, kind: input, shape index: {}]   ;;  %s5208_s11 = inlined_call_operand.vmem [shape: f32[32,2], index: 11, kind: output, shape index: {}]  }
   0x1   :  { %5209 = sst [smem:[#allocation11_spill]] %s5202_s5 }
   0x2   :  { %16 = vsyncpa [#allocation5], 0 }
   0x3   :  { %17 = vsyncpa [#allocation7], 0  ;;  %s4510_s17 = smov 0   ;;  %s4512_s18 = smov 0  }
   0x4   :  { %s4514_s19 = smov 0  }
   0x5 LB: > { %s4526_s20 = sadd.s32 4294967295, %s4441_s19   ;;  %s4529_s21 = sadd.s32 1, %s4441_s19   ;;  %s4441_s19 = sphi %s4514_s19, %s5218_s19   ;;  %s4437_s18 = sphi %s4512_s18, %s5217_s18   ;;  %s4433_s17 = sphi %s4510_s17, %s5216_s17  }
   0x6   : > { %s53_s22 = ssub.s32 %s4441_s19, %s4529_s21  ;;  %s58_s23 = sadd.s32 1, %s4437_s18 }
   0x7   : > { %s55_s24 = sor.u32 %s53_s22, %s53_s22  ;;  %p65_p0 = scmp.ne.s32.totalorder %s4437_s18, %s4433_s17 }
   0x8   : > { %p56_p1 = scmp.eq.s32.totalorder %s55_s24, 0  ;;  %p66_p2 = scmp.eq.s32.totalorder %s4441_s19, 0 }
   0x9   : > { %p3411_p3 = scmp.ge.s32.totalorder %s4441_s19, 1  ;;  %p304_p4 = scmp.lt.s32.totalorder %s4441_s19, 3 }
   0xa   : > { %s4540_s25 = scalar_select %p56_p1, %s4437_s18, %s58_s23  }
   0xb   : > { %p4542_p5 = por %p66_p2, %p65_p0  ;;  %p4546_p6 = pnand %p3411_p3, %p304_p4 }
   0xc   : > { %5210 = sst [smem:[#allocation10_spill]] %s4540_s25  ;;  %p4267_p7 = scmp.eq.s32.totalorder %s4526_s20, 0 }
   0xd   : > { %p4260_p8 = pneg %p4546_p6  ;;  %s4443_s28 = smov [#allocation4]  }
   0xe   : > { %s322_s29 = sshll.u32 %s4443_s28, 4  ;;  %s4444_s12 = smov [#allocation6]   ;;  %s323_s29 = int_to_ptr.vmem [resolvable:$true] %s322_s29 }
   0xf   : > { %p4555_p9 = pnand %p4267_p7, %p4260_p8  ;;  %s338_s13 = sshll.u32 %s4444_s12, 4  ;;  %s339_s13 = int_to_ptr.vmem [resolvable:$true] %s338_s13 }
  0x10   : > { %s4370_s14 = scalar_lea.vmem %s323_s29, 1280  ;;  %p4378_p0 = scmp.lt.s32.totalorder %s323_s29, %s323_s29 }
  0x11   : > { %p4361_p10 = pneg %p4555_p9  ;;  %p4371_p11 = scmp.ne.s32.totalorder %s323_s29, %s4370_s14 }
  0x12   : > { %p4379_p1 = scmp.lt.s32.totalorder %s4370_s14, %s4370_s14 }
  0x13   : > { %p4373_p12 = pnand %p4371_p11, %p4361_p10 }
  0x14   : > { %p4380_p2 = por %p4379_p1, %p4378_p0 }
  0x15   : > { %p4374_p13 = pneg %p4373_p12 }
  0x17   : > { %p4381_p3 = pnand %p4380_p2, %p4374_p13 }
  0x19   : > { %4384 = shalt.err (!%p4381_p3)
}
  0x1a   : > { %s4445_s15 = smov 64   ;;  %s4446_s16 = smov 4  }
  0x1b   : > { %s5214_s5 = sld [smem:[#allocation11_spill]]  ;;  %s4396_s24 = scalar_lea.vmem %s339_s13, 1536 }
  0x1c   : > { %p4397_p4 = scmp.ne.s32.totalorder %s339_s13, %s4396_s24  ;;  %p4404_p12 = scmp.lt.s32.totalorder %s339_s13, %s339_s13 }
  0x1d   : > { %p4405_p0 = scmp.lt.s32.totalorder %s4396_s24, %s4396_s24 }
  0x1e   : > { %p4399_p8 = pnand %p4397_p4, %p4361_p10 }
  0x1f   : > { %p4406_p13 = por %p4405_p0, %p4404_p12 }
  0x20   : > { %p4400_p11 = pneg %p4399_p8 }
  0x21   : > { %4263 = dma.hbm_to_vmem [thread:$0]  (!%p4555_p9), %s5214_s5, 1280, %s323_s29, [#allocation5], %s4445_s15, %s4445_s15, %s4446_s16  }
  0x22   : > { %p4407_p1 = pnand %p4406_p13, %p4400_p11 }
  0x24   : > { %4410 = shalt.err (!%p4407_p1)
}
  0x25   : > { %4266 = dma.hbm_to_vmem [thread:$0]  (!%p4555_p9), %s5204_s7, 1536, %s339_s13, [#allocation7], %s4445_s15, %s4445_s15, %s4446_s16  }
  0x26   : > { %p3414_p2 = scmp.ge.s32.totalorder %s4441_s19, 2 }
  0x28   : > { %357 = sbr.rel (%p3414_p2) target bundleno = 68 (0x44), region = 48 }
  0x2d   : > { %369 = sbr.rel (!%p4542_p5) target bundleno = 61 (0x3d), region = 56  ;;  %s371_s29 = sand.u32 (%p4542_p5), 1, %s4437_s18  }
  0x2e   : > { %s3574_s14 = sshll.u32 (%p4542_p5), %s4441_s19, 5  ;;  %s3415_s22 = sshll.u32 (%p4542_p5), %s371_s29, 6 }
  0x2f   : > { %s376_s23 = sadd.s32 (%p4542_p5), %s4441_s19, %s3574_s14  ;;  %s373_s13 = scalar_lea.vmem (%p4542_p5), [#allocation2], %s3415_s22 }
  0x30   : > { %s3418_s24 = sshll.u32 (%p4542_p5), %s376_s23, 2 }
  0x31   : > { %s4586_s25 = scalar_lea.vmem (%p4542_p5), %s5198_s1, %s3418_s24 }
  0x32   : > { %v395_v0 = vld [vmem:[%s4586_s25] sm:$0xf]  ;;  %v397_v1 = vld [vmem:[%s4586_s25 + $0x8] sm:$0xf]  ;;  %v399_v2 = vld [vmem:[%s4586_s25 + $0x10] sm:$0xf] }
  0x33   : > { %396 = vst [vmem:[%s373_s13] sm:$0xf] %v395_v0  ;;  %398 = vst [vmem:[%s373_s13 + $0x4] sm:$0xf] %v397_v1  ;;  %v401_v3 = vld [vmem:[%s4586_s25 + $0x18] sm:$0xf] }
  0x34   : > { %400 = vst [vmem:[%s373_s13 + $0x8] sm:$0xf] %v399_v2  ;;  %v403_v4 = vld [vmem:[%s4586_s25 + $0x20] sm:$0xf]  ;;  %v405_v5 = vld [vmem:[%s4586_s25 + $0x28] sm:$0xf] }
  0x35   : > { %402 = vst [vmem:[%s373_s13 + $0xc] sm:$0xf] %v401_v3  ;;  %404 = vst [vmem:[%s373_s13 + $0x10] sm:$0xf] %v403_v4  ;;  %v407_v6 = vld [vmem:[%s4586_s25 + $0x30] sm:$0xf] }
  0x36   : > { %406 = vst [vmem:[%s373_s13 + $0x14] sm:$0xf] %v405_v5  ;;  %v409_v7 = vld [vmem:[%s4586_s25 + $0x38] sm:$0xf]  ;;  %v411_v8 = vld [vmem:[%s4586_s25 + $0x40] sm:$0xf] }
  0x37   : > { %408 = vst [vmem:[%s373_s13 + $0x18] sm:$0xf] %v407_v6  ;;  %410 = vst [vmem:[%s373_s13 + $0x1c] sm:$0xf] %v409_v7  ;;  %v413_v9 = vld [vmem:[%s4586_s25 + $0x48] sm:$0xf] }
  0x38   : > { %412 = vst [vmem:[%s373_s13 + $0x20] sm:$0xf] %v411_v8  ;;  %v415_v10 = vld [vmem:[%s4586_s25 + $0x50] sm:$0xf]  ;;  %v417_v11 = vld [vmem:[%s4586_s25 + $0x58] sm:$0xf] }
  0x39   : > { %414 = vst [vmem:[%s373_s13 + $0x24] sm:$0xf] %v413_v9  ;;  %416 = vst [vmem:[%s373_s13 + $0x28] sm:$0xf] %v415_v10  ;;  %v419_v12 = vld [vmem:[%s4586_s25 + $0x60] sm:$0xf] }
  0x3a   : > { %418 = vst [vmem:[%s373_s13 + $0x2c] sm:$0xf] %v417_v11  ;;  %v421_v13 = vld [vmem:[%s4586_s25 + $0x68] sm:$0xf]  ;;  %v423_v14 = vld [vmem:[%s4586_s25 + $0x70] sm:$0xf] }
  0x3b   : > { %420 = vst [vmem:[%s373_s13 + $0x30] sm:$0xf] %v419_v12  ;;  %422 = vst [vmem:[%s373_s13 + $0x34] sm:$0xf] %v421_v13  ;;  %v425_v15 = vld [vmem:[%s4586_s25 + $0x78] sm:$0xf] }
  0x3c   : > { %424 = vst [vmem:[%s373_s13 + $0x38] sm:$0xf] %v423_v14  ;;  %426 = vst [vmem:[%s373_s13 + $0x3c] sm:$0xf] %v425_v15 }
  0x3d PF: > { %482 = sbr.rel (!%p4542_p5) target bundleno = 68 (0x44), region = 97  ;;  %s484_s5 = sand.u32 (%p4542_p5), 1, %s4437_s18  }
  0x3e   : > { %s3575_s15 = sshll.u32 (%p4542_p5), %s4441_s19, 2  ;;  %s3419_s16 = sshll.u32 (%p4542_p5), %s484_s5, 3 }
  0x3f   : > { %s489_s28 = sadd.s32 (%p4542_p5), %s4441_s19, %s3575_s15  ;;  %s486_s25 = scalar_lea.vmem (%p4542_p5), [#allocation3], %s3419_s16 }
  0x40   : > { %s3422_s12 = sshll.u32 (%p4542_p5), %s489_s28, 2 }
  0x41   : > { %s491_s22 = scalar_lea.vmem (%p4542_p5), %s5199_s2, %s3422_s12 }
  0x42   : > { %v508_v16 = vld [vmem:[%s491_s22] sm:$0xf]  ;;  %v510_v17 = vld [vmem:[%s491_s22 + $0x8] sm:$0xf] }
  0x43   : > { %509 = vst [vmem:[%s486_s25] sm:$0xf] %v508_v16  ;;  %511 = vst [vmem:[%s486_s25 + $0x4] sm:$0xf] %v510_v17 }
  0x44 PF: > { %542 = sbr.rel (%p4546_p6) target bundleno = 3761 (0xeb1), region = 138  ;;  %s545_s26 = sand.u32 (!%p4546_p6), 1, %s4433_s17  }
  0x45   : > { %s3424_s23 = sshll.u32 (!%p4546_p6), %s545_s26, 6  ;;  %s4615_s19 = sshll.u32 (!%p4546_p6), %s545_s26, 3 }
  0x46   : > { %s4617_s24 = scalar_lea.vmem (!%p4546_p6), [#allocation2], %s3424_s23  ;;  %s554_s30 = scalar_lea.vmem (!%p4546_p6), [#allocation3], %s4615_s19 }
  0x49   : > { %4424 = dma.done.wait (%p4267_p7), [#allocation5], 1280  }
  0x4a   : > { %4426 = vsyncadd (%p4267_p7), [#allocation5], 4294966016 }
  0x4b   : > { %4428 = dma.done.wait (%p4267_p7), [#allocation7], 1536  }
  0x4c   : > { %4430 = vsyncadd (%p4267_p7), [#allocation7], 4294965760  ;;  %s3428_s17 = sshll.u32 %s4526_s20, 4  ;;  %v4447_v18 = vmov 0   ;;  %v4633_v35 = vld [vmem:[%s4617_s24] sm:$0xff]   ;;  %v4640_v13 = vld [vmem:[%s4617_s24 + $0x8] sm:$0xff]  }
  0x4d   : > { %4303 = vset.pattern.permute.xlu1 %v4447_v18  ;;  %4302 = vset.pattern.permute.xlu0 %v4447_v18  ;;  %p609_p5 = scmp.lt.s32.totalorder %s3428_s17, 31  ;;  %v3432_v38 = vld [vmem:[%s5200_s3] ss:$0 sm:$0xff]  ;;  %v4643_v14 = vld [vmem:[%s4617_s24 + $0x10] sm:$0xff]   ;;  %v4648_v15 = vld [vmem:[%s4617_s24 + $0x18] sm:$0xff]   ;;  %vm962_vm0 = vcmask 261120  }
  0x4e   : > { %3816 = vmatprep.mubr.bf16.mxu0 %v4633_v35  ;;  %v4651_v16 = vld [vmem:[%s4617_s24 + $0x20] sm:$0xff]   ;;  %v4656_v17 = vld [vmem:[%s4617_s24 + $0x28] sm:$0xff]   ;;  %v4659_v18 = vld [vmem:[%s4617_s24 + $0x30] sm:$0xff]   ;;  %vm4449_vm1 = vmmov 0   ;;  %vm3266_vm2 = vcmask 15360   ;;  %s3430_s12 = sshll.u32 %s4526_s20, 1 }
  0x4f   : > { %s5220_s17 = smov (!%p609_p5, %s3428_s17), 31  ;;  %p617_p6 = scmp.lt.s32.totalorder %s3430_s12, 3 }
  0x50   : > { %s3429_s27 = sshll.u32 %s5220_s17, 3 }
  0x51   : > { %s612_s15 = scalar_lea.vmem %s5197_s0, %s3429_s27  ;;  %s5222_s12 = smov (!%p617_p6, %s3430_s12), 3 }
  0x52   : > { %v653_v19 = vld [vmem:[%s612_s15 + $0x70] sm:$0xff]  ;;  %v651_v20 = vld [vmem:[%s612_s15 + $0x60] sm:$0xff]  ;;  %v654_v21 = vld [vmem:[%s612_s15 + $0x78] sm:$0xff]  ;;  %s3431_s29 = sshll.u32 %s5222_s12, 3 }
  0x53   : > { %728 = vperm.xlu0 %4302, %v653_v19   ;;  %718 = vperm.xlu1 %4303, %v651_v20   ;;  %v652_v22 = vld [vmem:[%s612_s15 + $0x68] sm:$0xff]  ;;  %v650_v23 = vld [vmem:[%s612_s15 + $0x58] sm:$0xff]  ;;  %v649_v24 = vld [vmem:[%s612_s15 + $0x50] sm:$0xff]  ;;  %s620_s25 = scalar_lea.vmem %s5208_s11, %s3431_s29 }
  0x54   : > { %v648_v25 = vld [vmem:[%s612_s15 + $0x48] sm:$0xff]  ;;  %v647_v26 = vld [vmem:[%s612_s15 + $0x40] sm:$0xff]  ;;  %v646_v27 = vld [vmem:[%s612_s15 + $0x38] sm:$0xff] }
  0x55   : > { %v645_v28 = vld [vmem:[%s612_s15 + $0x30] sm:$0xff]  ;;  %v644_v29 = vld [vmem:[%s612_s15 + $0x28] sm:$0xff]  ;;  %v643_v30 = vld [vmem:[%s612_s15 + $0x20] sm:$0xff] }
  0x56   : > { %v642_v31 = vld [vmem:[%s612_s15 + $0x18] sm:$0xff]  ;;  %v641_v32 = vld [vmem:[%s612_s15 + $0x10] sm:$0xff]  ;;  %v640_v33 = vld [vmem:[%s612_s15 + $0x8] sm:$0xff] }
  0x57   : > { %733 = vperm.xlu0 %4302, %v654_v21   ;;  %723 = vperm.xlu1 %4303, %v652_v22   ;;  %v639_v34 = vld [vmem:[%s612_s15] sm:$0xff]  ;;  %v4664_v19 = vld [vmem:[%s4617_s24 + $0x38] sm:$0xff]   ;;  %v4313_v21 = vld [vmem:[#allocation4] sm:$0xff]  }
  0x58   : > { %v4312_v20 = vld [vmem:[#allocation4 + $0x8] sm:$0xff]  }
  0x59   : > { %3832 = vmatprep.subr.bf16.mxu1 %v4312_v20 }
  0x5a   : > { %3833 = vmatpush3.bf16.msra.mxu1 %v4312_v20 }
  0x5b   : > { %713 = vperm.xlu1 %4303, %v650_v23   ;;  %708 = vperm.xlu0 %4302, %v649_v24   ;;  %v3433_v24 = vld [vmem:[%s5201_s4] ss:$0 sm:$0xff] }
  0x5c   : > { %3834 = vmatprep.subr.bf16.mxu1 %v4313_v21 }
  0x5e   : > { %3835 = vmatpush3.bf16.msra.mxu1 %v4313_v21 }
  0x5f   : > { %703 = vperm.xlu1 %4303, %v648_v25   ;;  %698 = vperm.xlu0 %4302, %v647_v26  }
  0x63   : > { %693 = vperm.xlu1 %4303, %v646_v27   ;;  %688 = vperm.xlu0 %4302, %v645_v28  }
  0x67   : > { %683 = vperm.xlu1 %4303, %v644_v29   ;;  %678 = vperm.xlu0 %4302, %v643_v30  }
  0x6b   : > { %673 = vperm.xlu1 %4303, %v642_v31   ;;  %668 = vperm.xlu0 %4302, %v641_v32  }
  0x6f   : > { %663 = vperm.xlu1 %4303, %v640_v33   ;;  %658 = vperm.xlu0 %4302, %v639_v34  }
  0xce   : > { %v729_v36 = vpop.permute.xlu0 %728  ;;  %v719_v37 = vpop.permute.xlu1 %718 }
  0xcf   : > { %v756_v41 = vmul.f32 %v3432_v38, %v729_v36  ;;  %v754_v42 = vmul.f32 %v3432_v38, %v719_v37 }
  0xd2   : > { %v734_v39 = vpop.permute.xlu0 %733  ;;  %v724_v40 = vpop.permute.xlu1 %723 }
  0xd3   : > { %v757_v43 = vmul.f32 %v3432_v38, %v734_v39  ;;  %v755_v44 = vmul.f32 %v3432_v38, %v724_v40 }
  0xd5   : > { %v765_v45 = vpack.c.bf16 %v757_v43, %v756_v41  ;;  %v764_v48 = vpack.c.bf16 %v755_v44, %v754_v42 }
  0xd6   : > { %v714_v46 = vpop.permute.xlu1 %713  ;;  %v709_v47 = vpop.permute.xlu0 %708 }
  0xd7   : > { %v753_v49 = vmul.f32 %v3432_v38, %v714_v46  ;;  %v752_v50 = vmul.f32 %v3432_v38, %v709_v47  ;;  %3800 = vmatprep.subr.bf16.mxu0 %v765_v45 }
  0xd8   : > { %3801 = vmatpush3.bf16.msra.mxu0 %v765_v45 }
  0xd9   : > { %3802 = vmatprep.subr.bf16.mxu0 %v764_v48  ;;  %v763_v53 = vpack.c.bf16 %v753_v49, %v752_v50 }
  0xda   : > { %v704_v51 = vpop.permute.xlu1 %703  ;;  %v699_v52 = vpop.permute.xlu0 %698 }
  0xdb   : > { %v751_v54 = vmul.f32 %v3432_v38, %v704_v51  ;;  %v750_v55 = vmul.f32 %v3432_v38, %v699_v52 }
  0xdc   : > { %3803 = vmatpush3.bf16.msra.mxu0 %v764_v48 }
  0xdd   : > { %3804 = vmatprep.subr.bf16.mxu0 %v763_v53  ;;  %v762_v58 = vpack.c.bf16 %v751_v54, %v750_v55 }
  0xde   : > { %v694_v56 = vpop.permute.xlu1 %693  ;;  %v689_v57 = vpop.permute.xlu0 %688 }
  0xdf   : > { %v749_v59 = vmul.f32 %v3432_v38, %v694_v56  ;;  %v748_v60 = vmul.f32 %v3432_v38, %v689_v57 }
  0xe0   : > { %3805 = vmatpush3.bf16.msra.mxu0 %v763_v53 }
  0xe1   : > { %3806 = vmatprep.subr.bf16.mxu0 %v762_v58  ;;  %v761_v63 = vpack.c.bf16 %v749_v59, %v748_v60 }
  0xe2   : > { %v684_v61 = vpop.permute.xlu1 %683  ;;  %v679_v62 = vpop.permute.xlu0 %678 }
  0xe3   : > { %v747_v0 = vmul.f32 %v3432_v38, %v684_v61  ;;  %v746_v1 = vmul.f32 %v3432_v38, %v679_v62 }
  0xe4   : > { %3807 = vmatpush3.bf16.msra.mxu0 %v762_v58 }
  0xe5   : > { %3808 = vmatprep.subr.bf16.mxu0 %v761_v63  ;;  %v760_v4 = vpack.c.bf16 %v747_v0, %v746_v1 }
  0xe6   : > { %v674_v2 = vpop.permute.xlu1 %673  ;;  %v669_v3 = vpop.permute.xlu0 %668 }
  0xe7   : > { %v745_v5 = vmul.f32 %v3432_v38, %v674_v2  ;;  %v744_v6 = vmul.f32 %v3432_v38, %v669_v3 }
  0xe8   : > { %3809 = vmatpush3.bf16.msra.mxu0 %v761_v63 }
  0xe9   : > { %3810 = vmatprep.subr.bf16.mxu0 %v760_v4  ;;  %v759_v9 = vpack.c.bf16 %v745_v5, %v744_v6 }
  0xea   : > { %v664_v7 = vpop.permute.xlu1 %663  ;;  %v659_v8 = vpop.permute.xlu0 %658 }
  0xeb   : > { %v743_v10 = vmul.f32 %v3432_v38, %v664_v7  ;;  %v742_v11 = vmul.f32 %v3432_v38, %v659_v8 }
  0xec   : > { %3811 = vmatpush3.bf16.msra.mxu0 %v760_v4 }
  0xed   : > { %3812 = vmatprep.subr.bf16.mxu0 %v759_v9  ;;  %v758_v12 = vpack.c.bf16 %v743_v10, %v742_v11 }
  0xf0   : > { %3813 = vmatpush3.bf16.msra.mxu0 %v759_v9 }
  0xf1   : > { %3814 = vmatprep.subr.bf16.mxu0 %v758_v12 }
  0xf4   : > { %3815 = vmatpush3.bf16.msra.mxu0 %v758_v12 }
  0xf7   : > { %3817 = vmatmul.mubr.bf16.vlgmr.msra.gmra.mxu0 %v4640_v13 }
  0xf8   : > { %3820 = vmatprep.mubr.bf16.mxu0 %v4643_v14 }
  0xff   : > { %3821 = vmatmul.mubr.bf16.gmra.mxu0 %v4648_v15 }
 0x100   : > { %3824 = vmatprep.mubr.bf16.mxu0 %v4651_v16 }
 0x107   : > { %3825 = vmatmul.mubr.bf16.gmra.mxu0 %v4656_v17 }
 0x108   : > { %3828 = vmatprep.mubr.bf16.mxu0 %v4659_v18 }
 0x10f   : > { %3829 = vmatmul.mubr.bf16.gmra.mxu0 %v4664_v19 }
 0x1b7   : > { %v3818_v22 = vpop.f32.mrf.mxu0 }
 0x1b8   : > { %v864_v28 = vadd.f32 %v3818_v22, %v3433_v24 }
 0x1b9   : > { %v855_v23 = vpop.f32.mrf.mxu0 }
 0x1ba   : > { %v856_v26 = vadd.f32 %v3433_v24, %v855_v23  ;;  %v920_v36 = vmax.f32 %v864_v28, 0.0  ;;  %v4316_v23 = vld [vmem:[#allocation6 + $0x18] sm:$0xff]  }
 0x1bb   : > { %v3819_v25 = vpop.f32.mrf.mxu0  ;;  %3884 = vmatprep.subr.bf16.mxu0 %v4316_v23 }
 0x1bc   : > { %v867_v27 = vadd.f32 %v3819_v25, %v3433_v24  ;;  %v918_v33 = vmax.f32 %v856_v26, 0.0  ;;  %v4317_v25 = vld [vmem:[#allocation6 + $0x10] sm:$0xff]   ;;  %3885 = vmatpush3.bf16.msra.mxu0 %v4316_v23 }
 0x1bd   : > { %v858_v29 = vpop.f32.mrf.mxu0  ;;  %3886 = vmatprep.subr.bf16.mxu0 %v4317_v25 }
 0x1be   : > { %v859_v30 = vadd.f32 %v3433_v24, %v858_v29  ;;  %v921_v31 = vmax.f32 %v867_v27, 0.0 }
 0x1bf   : > { %v3822_v32 = vpop.f32.mrf.mxu0 }
 0x1c0   : > { %v919_v34 = vmax.f32 %v859_v30, 0.0  ;;  %v4672_v39 = vpack.c.bf16 %v921_v31, %v920_v36  ;;  %v880_v43 = vadd.f32 %v3822_v32, %v3433_v24  ;;  %3887 = vmatpush3.bf16.msra.mxu0 %v4317_v25 }
 0x1c1   : > { %v871_v37 = vpop.f32.mrf.mxu0 }
 0x1c2   : > { %v4670_v38 = vpack.c.bf16 %v919_v34, %v918_v33  ;;  %v872_v41 = vadd.f32 %v3433_v24, %v871_v37  ;;  %v924_v50 = vmax.f32 %v880_v43, 0.0 }
 0x1c3   : > { %v3823_v40 = vpop.f32.mrf.mxu0 }
 0x1c4   : > { %v883_v42 = vadd.f32 %v3823_v40, %v3433_v24  ;;  %3836 = vmatprep.mubr.msk.bf16.mxu1 %vm962_vm0, %v4670_v38  ;;  %v922_v48 = vmax.f32 %v872_v41, 0.0 }
 0x1c5   : > { %v874_v44 = vpop.f32.mrf.mxu0  ;;  %3837 = vmatmul.mubr.msk.bf16.vlgmr.msra.gmra.mxu1 %vm962_vm0, %v4672_v39 }
 0x1c6   : > { %v875_v45 = vadd.f32 %v3433_v24, %v874_v44  ;;  %v925_v46 = vmax.f32 %v883_v42, 0.0 }
 0x1c7   : > { %v3826_v47 = vpop.f32.mrf.mxu0 }
 0x1c8   : > { %v923_v49 = vmax.f32 %v875_v45, 0.0  ;;  %v4680_v53 = vpack.c.bf16 %v925_v46, %v924_v50  ;;  %v896_v57 = vadd.f32 %v3826_v47, %v3433_v24 }
 0x1c9   : > { %v887_v51 = vpop.f32.mrf.mxu0 }
 0x1ca   : > { %v4678_v52 = vpack.c.bf16 %v923_v49, %v922_v48  ;;  %v888_v55 = vadd.f32 %v3433_v24, %v887_v51  ;;  %v928_v0 = vmax.f32 %v896_v57, 0.0 }
 0x1cb   : > { %v3827_v54 = vpop.f32.mrf.mxu0 }
 0x1cc   : > { %v899_v56 = vadd.f32 %v3827_v54, %v3433_v24  ;;  %3840 = vmatprep.mubr.msk.bf16.mxu1 %vm962_vm0, %v4678_v52  ;;  %v926_v62 = vmax.f32 %v888_v55, 0.0  ;;  %v4314_v54 = vld [vmem:[#allocation6 + $0x8] sm:$0xff]   ;;  %v4315_v55 = vld [vmem:[#allocation6] sm:$0xff]  }
 0x1cd   : > { %v890_v58 = vpop.f32.mrf.mxu0  ;;  %3841 = vmatmul.mubr.msk.bf16.gmra.mxu1 %vm962_vm0, %v4680_v53 }
 0x1ce   : > { %v891_v59 = vadd.f32 %v3433_v24, %v890_v58  ;;  %v929_v60 = vmax.f32 %v899_v56, 0.0 }
 0x1cf   : > { %v3830_v61 = vpop.f32.mrf.mxu0 }
 0x1d0   : > { %v927_v63 = vmax.f32 %v891_v59, 0.0  ;;  %v4688_v3 = vpack.c.bf16 %v929_v60, %v928_v0  ;;  %v912_v7 = vadd.f32 %v3830_v61, %v3433_v24 }
 0x1d1   : > { %v903_v1 = vpop.f32.mrf.mxu0 }
 0x1d2   : > { %v4686_v2 = vpack.c.bf16 %v927_v63, %v926_v62  ;;  %v904_v5 = vadd.f32 %v3433_v24, %v903_v1  ;;  %v932_v20 = vmax.f32 %v912_v7, 0.0  ;;  %v4319_v7 = vld [vmem:[#allocation4 + $0x10] sm:$0xff]  }
 0x1d3   : > { %v3831_v4 = vpop.f32.mrf.mxu0 }
 0x1d4   : > { %v915_v6 = vadd.f32 %v3831_v4, %v3433_v24  ;;  %3844 = vmatprep.mubr.msk.bf16.mxu1 %vm962_vm0, %v4686_v2  ;;  %v930_v11 = vmax.f32 %v904_v5, 0.0 }
 0x1d5   : > { %v906_v8 = vpop.f32.mrf.mxu0  ;;  %3845 = vmatmul.mubr.msk.bf16.gmra.mxu1 %vm962_vm0, %v4688_v3 }
 0x1d6   : > { %v907_v9 = vadd.f32 %v3433_v24, %v906_v8  ;;  %v933_v10 = vmax.f32 %v915_v6, 0.0 }
 0x1d8   : > { %v931_v12 = vmax.f32 %v907_v9, 0.0  ;;  %v4696_v22 = vpack.c.bf16 %v933_v10, %v932_v20 }
 0x1da   : > { %v4694_v21 = vpack.c.bf16 %v931_v12, %v930_v11 }
 0x1dc   : > { %3848 = vmatprep.mubr.msk.bf16.mxu1 %vm962_vm0, %v4694_v21 }
 0x1dd   : > { %3849 = vmatmul.mubr.msk.bf16.gmra.mxu1 %vm962_vm0, %v4696_v22 }
 0x1de   : > { %3868 = vmatprep.mubr.bf16.mxu1 %v4633_v35 }
 0x285   : > { %v3838_v24 = vpop.f32.mrf.mxu1 }
 0x287   : > { %v1021_v26 = vpop.f32.mrf.mxu1 }
 0x289   : > { %v3839_v27 = vpop.f32.mrf.mxu1 }
 0x28a   : > { %v1085_v50 = vpack.c.bf16 %v3839_v27, %v3838_v24 }
 0x28b   : > { %v1024_v28 = vpop.f32.mrf.mxu1 }
 0x28c   : > { %v1084_v51 = vpack.c.bf16 %v1024_v28, %v1021_v26 }
 0x28d   : > { %v3842_v29 = vpop.f32.mrf.mxu1 }
 0x28f   : > { %v1037_v30 = vpop.f32.mrf.mxu1 }
 0x291   : > { %v3843_v31 = vpop.f32.mrf.mxu1 }
 0x292   : > { %v1087_v48 = vpack.c.bf16 %v3843_v31, %v3842_v29 }
 0x293   : > { %v1040_v32 = vpop.f32.mrf.mxu1 }
 0x294   : > { %v1086_v49 = vpack.c.bf16 %v1040_v32, %v1037_v30 }
 0x295   : > { %v3846_v33 = vpop.f32.mrf.mxu1 }
 0x297   : > { %v1053_v34 = vpop.f32.mrf.mxu1 }
 0x299   : > { %v3847_v36 = vpop.f32.mrf.mxu1 }
 0x29a   : > { %v1089_v46 = vpack.c.bf16 %v3847_v36, %v3846_v33 }
 0x29b   : > { %v1056_v37 = vpop.f32.mrf.mxu1 }
 0x29c   : > { %v1088_v47 = vpack.c.bf16 %v1056_v37, %v1053_v34 }
 0x29d   : > { %v3850_v40 = vpop.f32.mrf.mxu1 }
 0x29f   : > { %v1069_v41 = vpop.f32.mrf.mxu1 }
 0x2a1   : > { %v3851_v42 = vpop.f32.mrf.mxu1 }
 0x2a2   : > { %v1091_v43 = vpack.c.bf16 %v3851_v42, %v3850_v40 }
 0x2a3   : > { %v1072_v44 = vpop.f32.mrf.mxu1 }
 0x2a4   : > { %v1090_v45 = vpack.c.bf16 %v1072_v44, %v1069_v41  ;;  %3852 = vmatprep.subr.bf16.mxu1 %v1091_v43 }
 0x2a5   : > { %3853 = vmatpush3.bf16.msra.mxu1 %v1091_v43 }
 0x2a6   : > { %3854 = vmatprep.subr.bf16.mxu1 %v1090_v45 }
 0x2a9   : > { %3855 = vmatpush3.bf16.msra.mxu1 %v1090_v45 }
 0x2aa   : > { %3856 = vmatprep.subr.bf16.mxu1 %v1089_v46 }
 0x2ad   : > { %3857 = vmatpush3.bf16.msra.mxu1 %v1089_v46 }
 0x2ae   : > { %3858 = vmatprep.subr.bf16.mxu1 %v1088_v47 }
 0x2b1   : > { %3859 = vmatpush3.bf16.msra.mxu1 %v1088_v47 }
 0x2b2   : > { %3860 = vmatprep.subr.bf16.mxu1 %v1087_v48 }
 0x2b5   : > { %3861 = vmatpush3.bf16.msra.mxu1 %v1087_v48 }
 0x2b6   : > { %3862 = vmatprep.subr.bf16.mxu1 %v1086_v49 }
 0x2b9   : > { %3863 = vmatpush3.bf16.msra.mxu1 %v1086_v49 }
 0x2ba   : > { %3864 = vmatprep.subr.bf16.mxu1 %v1085_v50 }
 0x2bd   : > { %3865 = vmatpush3.bf16.msra.mxu1 %v1085_v50 }
 0x2be   : > { %3866 = vmatprep.subr.bf16.mxu1 %v1084_v51 }
 0x2c1   : > { %3867 = vmatpush3.bf16.msra.mxu1 %v1084_v51 }
 0x2c2   : > { %3904 = vmatprep.subr.bf16.mxu1 %v4314_v54 }
 0x2c4   : > { %3869 = vmatmul.mubr.bf16.vlgmr.msra.gmra.mxu1 %v4640_v13 }
 0x2c5   : > { %3872 = vmatprep.mubr.bf16.mxu1 %v4643_v14  ;;  %3905 = vmatpush3.bf16.msra.mxu1 %v4314_v54 }
 0x2c6   : > { %3906 = vmatprep.subr.bf16.mxu1 %v4315_v55 }
 0x2c9   : > { %3907 = vmatpush3.bf16.msra.mxu1 %v4315_v55 }
 0x2cc   : > { %3873 = vmatmul.mubr.bf16.gmra.mxu1 %v4648_v15 }
 0x2cd   : > { %3876 = vmatprep.mubr.bf16.mxu1 %v4651_v16 }
 0x2d4   : > { %3877 = vmatmul.mubr.bf16.gmra.mxu1 %v4656_v17 }
 0x2d5   : > { %3880 = vmatprep.mubr.bf16.mxu1 %v4659_v18 }
 0x2dc   : > { %3881 = vmatmul.mubr.bf16.gmra.mxu1 %v4664_v19 }
 0x2dd   : > { %3908 = vmatprep.mubr.msk.bf16.mxu1 %vm962_vm0, %v4670_v38  ;;  %v4318_v38 = vld [vmem:[#allocation4 + $0x18] sm:$0xff]  }
 0x2de   : > { %3924 = vmatprep.subr.bf16.mxu0 %v4318_v38 }
 0x2e4   : > { %3909 = vmatmul.mubr.msk.bf16.vlgmr.msra.gmra.mxu1 %vm962_vm0, %v4672_v39 }
 0x2e5   : > { %3912 = vmatprep.mubr.msk.bf16.mxu1 %vm962_vm0, %v4678_v52 }
 0x2ec   : > { %3913 = vmatmul.mubr.msk.bf16.gmra.mxu1 %vm962_vm0, %v4680_v53  ;;  %v3452_v53 = vld [vmem:[%s5203_s6] ss:$0 sm:$0xff] }
 0x2ed   : > { %3916 = vmatprep.mubr.msk.bf16.mxu1 %vm962_vm0, %v4686_v2 }
 0x2f4   : > { %3917 = vmatmul.mubr.msk.bf16.gmra.mxu1 %vm962_vm0, %v4688_v3 }
 0x2f5   : > { %3920 = vmatprep.mubr.msk.bf16.mxu1 %vm962_vm0, %v4694_v21 }
 0x2fc   : > { %3921 = vmatmul.mubr.msk.bf16.gmra.mxu1 %vm962_vm0, %v4696_v22 }
 0x2fd   : > { %3960 = vmatprep.mubr.bf16.mxu1 %v4633_v35 }
 0x384   : > { %v3870_v39 = vpop.f32.mrf.mxu1 }
 0x385   : > { %v1142_v59 = vadd.f32 %v3870_v39, %v3452_v53 }
 0x386   : > { %v1133_v52 = vpop.f32.mrf.mxu1 }
 0x387   : > { %v1134_v57 = vadd.f32 %v3452_v53, %v1133_v52  ;;  %v1198_v2 = vmax.f32 %v1142_v59, 0.0 }
 0x388   : > { %v3871_v56 = vpop.f32.mrf.mxu1 }
 0x389   : > { %v1145_v58 = vadd.f32 %v3871_v56, %v3452_v53  ;;  %v1196_v0 = vmax.f32 %v1134_v57, 0.0 }
 0x38a   : > { %v1136_v60 = vpop.f32.mrf.mxu1 }
 0x38b   : > { %v1137_v61 = vadd.f32 %v3452_v53, %v1136_v60  ;;  %v1199_v62 = vmax.f32 %v1145_v58, 0.0 }
 0x38c   : > { %v3874_v63 = vpop.f32.mrf.mxu1 }
 0x38d   : > { %v1197_v1 = vmax.f32 %v1137_v61, 0.0  ;;  %v1213_v5 = vpack.c.bf16 %v1199_v62, %v1198_v2  ;;  %v1158_v10 = vadd.f32 %v3874_v63, %v3452_v53 }
 0x38e   : > { %v1149_v3 = vpop.f32.mrf.mxu1 }
 0x38f   : > { %v1212_v4 = vpack.c.bf16 %v1197_v1, %v1196_v0  ;;  %v1150_v8 = vadd.f32 %v3452_v53, %v1149_v3  ;;  %v1202_v25 = vmax.f32 %v1158_v10, 0.0 }
 0x390   : > { %v3875_v6 = vpop.f32.mrf.mxu1 }
 0x391   : > { %v1161_v9 = vadd.f32 %v3875_v6, %v3452_v53  ;;  %3888 = vmatprep.mubr.msk.bf16.mxu0 %vm962_vm0, %v1212_v4  ;;  %v1200_v22 = vmax.f32 %v1150_v8, 0.0 }
 0x392   : > { %v1152_v11 = vpop.f32.mrf.mxu1  ;;  %3889 = vmatmul.mubr.msk.bf16.vlgmr.msra.gmra.mxu0 %vm962_vm0, %v1213_v5 }
 0x393   : > { %v1153_v12 = vadd.f32 %v3452_v53, %v1152_v11  ;;  %3925 = vmatpush3.bf16.msra.mxu0 %v4318_v38  ;;  %v1203_v20 = vmax.f32 %v1161_v9, 0.0 }
 0x394   : > { %v3878_v21 = vpop.f32.mrf.mxu1  ;;  %3926 = vmatprep.subr.bf16.mxu0 %v4319_v7 }
 0x395   : > { %v1201_v23 = vmax.f32 %v1153_v12, 0.0  ;;  %v1215_v27 = vpack.c.bf16 %v1203_v20, %v1202_v25  ;;  %v1174_v31 = vadd.f32 %v3878_v21, %v3452_v53 }
 0x396   : > { %v1165_v24 = vpop.f32.mrf.mxu1 }
 0x397   : > { %v1214_v26 = vpack.c.bf16 %v1201_v23, %v1200_v22  ;;  %3927 = vmatpush3.bf16.msra.mxu0 %v4319_v7  ;;  %v1166_v29 = vadd.f32 %v3452_v53, %v1165_v24  ;;  %v1206_v41 = vmax.f32 %v1174_v31, 0.0 }
 0x398   : > { %v3879_v28 = vpop.f32.mrf.mxu1 }
 0x399   : > { %v1177_v30 = vadd.f32 %v3879_v28, %v3452_v53  ;;  %3892 = vmatprep.mubr.msk.bf16.mxu0 %vm962_vm0, %v1214_v26  ;;  %v1204_v37 = vmax.f32 %v1166_v29, 0.0 }
 0x39a   : > { %v1168_v32 = vpop.f32.mrf.mxu1  ;;  %3893 = vmatmul.mubr.msk.bf16.gmra.mxu0 %vm962_vm0, %v1215_v27 }
 0x39b   : > { %v1169_v33 = vadd.f32 %v3452_v53, %v1168_v32  ;;  %v1207_v34 = vmax.f32 %v1177_v30, 0.0 }
 0x39c   : > { %v3882_v36 = vpop.f32.mrf.mxu1 }
 0x39d   : > { %v1205_v40 = vmax.f32 %v1169_v33, 0.0  ;;  %v1217_v44 = vpack.c.bf16 %v1207_v34, %v1206_v41  ;;  %v1190_v48 = vadd.f32 %v3882_v36, %v3452_v53  ;;  %v4320_v41 = vld [vmem:[#allocation4 + $0x28] sm:$0xff]  }
 0x39e   : > { %v1181_v42 = vpop.f32.mrf.mxu1 }
 0x39f   : > { %v1216_v43 = vpack.c.bf16 %v1205_v40, %v1204_v37  ;;  %v1182_v46 = vadd.f32 %v3452_v53, %v1181_v42  ;;  %v1210_v38 = vmax.f32 %v1190_v48, 0.0  ;;  %v4321_v42 = vld [vmem:[#allocation4 + $0x20] sm:$0xff]  }
 0x3a0   : > { %v3883_v45 = vpop.f32.mrf.mxu1 }
 0x3a1   : > { %v1193_v47 = vadd.f32 %v3883_v45, %v3452_v53  ;;  %3896 = vmatprep.mubr.msk.bf16.mxu0 %vm962_vm0, %v1216_v43  ;;  %v1208_v54 = vmax.f32 %v1182_v46, 0.0 }
 0x3a2   : > { %v1184_v49 = vpop.f32.mrf.mxu1  ;;  %3897 = vmatmul.mubr.msk.bf16.gmra.mxu0 %vm962_vm0, %v1217_v44 }
 0x3a3   : > { %v1185_v50 = vadd.f32 %v3452_v53, %v1184_v49  ;;  %v1211_v51 = vmax.f32 %v1193_v47, 0.0 }
 0x3a4   : > { %v4785_v45 = vpop.f32.mrf.mxu1 }
 0x3a5   : > { %v1209_v55 = vmax.f32 %v1185_v50, 0.0  ;;  %v1219_v52 = vpack.c.bf16 %v1211_v51, %v1210_v38 }
 0x3a6   : > { %v4787_v46 = vpop.f32.mrf.mxu1 }
 0x3a7   : > { %v1218_v39 = vpack.c.bf16 %v1209_v55, %v1208_v54 }
 0x3a8   : > { %v4789_v47 = vpop.f32.mrf.mxu1 }
 0x3a9   : > { %3900 = vmatprep.mubr.msk.bf16.mxu0 %vm962_vm0, %v1218_v39 }
 0x3aa   : > { %3901 = vmatmul.mubr.msk.bf16.gmra.mxu0 %vm962_vm0, %v1219_v52  ;;  %v4791_v48 = vpop.f32.mrf.mxu1 }
 0x3ab   : > { %3928 = vmatprep.mubr.msk.bf16.mxu0 %vm962_vm0, %v1212_v4 }
 0x3ac   : > { %v4793_v49 = vpop.f32.mrf.mxu1 }
 0x3ae   : > { %v4795_v50 = vpop.f32.mrf.mxu1 }
 0x3b0   : > { %v4797_v51 = vpop.f32.mrf.mxu1 }
 0x3b2   : > { %3929 = vmatmul.mubr.msk.bf16.vlgmr.msra.gmra.mxu0 %vm962_vm0, %v1213_v5  ;;  %v4799_v54 = vpop.f32.mrf.mxu1 }
 0x3b3   : > { %3932 = vmatprep.mubr.msk.bf16.mxu0 %vm962_vm0, %v1214_v26 }
 0x3b4   : > { %v4801_v55 = vpop.f32.mrf.mxu1 }
 0x3b6   : > { %v4803_v38 = vpop.f32.mrf.mxu1 }
 0x3ba   : > { %3933 = vmatmul.mubr.msk.bf16.gmra.mxu0 %vm962_vm0, %v1215_v27 }
 0x3bb   : > { %3936 = vmatprep.mubr.msk.bf16.mxu0 %vm962_vm0, %v1216_v43  ;;  %v4322_v43 = vld [vmem:[#allocation6 + $0x28] sm:$0xff]  }
 0x3bc   : > { %3976 = vmatprep.subr.bf16.mxu0 %v4322_v43 }
 0x3bd   : > { %3977 = vmatpush3.bf16.msra.mxu0 %v4322_v43 }
 0x3c2   : > { %3937 = vmatmul.mubr.msk.bf16.gmra.mxu0 %vm962_vm0, %v1217_v44  ;;  %v4323_v44 = vld [vmem:[#allocation6 + $0x20] sm:$0xff]  }
 0x3c3   : > { %3940 = vmatprep.mubr.msk.bf16.mxu0 %vm962_vm0, %v1218_v39  ;;  %3978 = vmatprep.subr.bf16.mxu0 %v4323_v44  ;;  %v4805_v39 = vpop.f32.mrf.mxu1 }
 0x3c4   : > { %3979 = vmatpush3.bf16.msra.mxu0 %v4323_v44 }
 0x3ca   : > { %3941 = vmatmul.mubr.msk.bf16.gmra.mxu0 %vm962_vm0, %v1219_v52  ;;  %v4807_v52 = vpop.f32.mrf.mxu1 }
 0x452   : > { %v4746_v53 = vpop.f32.mrf.mxu0 }
 0x454   : > { %v4748_v56 = vpop.f32.mrf.mxu0 }
 0x456   : > { %v4750_v57 = vpop.f32.mrf.mxu0 }
 0x458   : > { %v4752_v58 = vpop.f32.mrf.mxu0 }
 0x45a   : > { %v4754_v59 = vpop.f32.mrf.mxu0 }
 0x45c   : > { %v4756_v60 = vpop.f32.mrf.mxu0 }
 0x45e   : > { %v4758_v61 = vpop.f32.mrf.mxu0 }
 0x460   : > { %v4760_v62 = vpop.f32.mrf.mxu0 }
 0x462   : > { %v4762_v63 = vpop.f32.mrf.mxu0 }
 0x464   : > { %v4764_v0 = vpop.f32.mrf.mxu0 }
 0x466   : > { %v4766_v1 = vpop.f32.mrf.mxu0 }
 0x468   : > { %v4768_v2 = vpop.f32.mrf.mxu0 }
 0x46a   : > { %v4770_v3 = vpop.f32.mrf.mxu0 }
 0x46c   : > { %v4772_v4 = vpop.f32.mrf.mxu0 }
 0x46e   : > { %v4774_v5 = vpop.f32.mrf.mxu0 }
 0x470   : > { %v4776_v6 = vpop.f32.mrf.mxu0 }
 0x472   : > { %v3930_v7 = vpop.f32.mrf.mxu0 }
 0x474   : > { %v1518_v8 = vpop.f32.mrf.mxu0 }
 0x476   : > { %v3931_v9 = vpop.f32.mrf.mxu0 }
 0x477   : > { %v1582_v37 = vpack.c.bf16 %v3931_v9, %v3930_v7  ;;  %v4809_v7 = vpop.f32.mrf.mxu1 }
 0x478   : > { %v1521_v10 = vpop.f32.mrf.mxu0 }
 0x479   : > { %v1581_v40 = vpack.c.bf16 %v1521_v10, %v1518_v8  ;;  %v4811_v8 = vpop.f32.mrf.mxu1 }
 0x47a   : > { %v3934_v11 = vpop.f32.mrf.mxu0 }
 0x47b   : > { %v4813_v9 = vpop.f32.mrf.mxu1 }
 0x47c   : > { %v1534_v12 = vpop.f32.mrf.mxu0 }
 0x47d   : > { %v4815_v10 = vpop.f32.mrf.mxu1 }
 0x47e   : > { %v3935_v20 = vpop.f32.mrf.mxu0 }
 0x47f   : > { %v1584_v34 = vpack.c.bf16 %v3935_v20, %v3934_v11  ;;  %v3484_v20 = vld [vmem:[%s5203_s6 + $0x1] ss:$0 sm:$0xff] }
 0x480   : > { %v1537_v21 = vpop.f32.mrf.mxu0 }
 0x481   : > { %v1583_v36 = vpack.c.bf16 %v1537_v21, %v1534_v12 }
 0x482   : > { %v3938_v22 = vpop.f32.mrf.mxu0 }
 0x484   : > { %v1550_v23 = vpop.f32.mrf.mxu0 }
 0x486   : > { %v3939_v25 = vpop.f32.mrf.mxu0 }
 0x487   : > { %v1586_v32 = vpack.c.bf16 %v3939_v25, %v3938_v22 }
 0x488   : > { %v1553_v24 = vpop.f32.mrf.mxu0 }
 0x489   : > { %v1585_v33 = vpack.c.bf16 %v1553_v24, %v1550_v23 }
 0x48a   : > { %v3942_v26 = vpop.f32.mrf.mxu0 }
 0x48c   : > { %v1566_v27 = vpop.f32.mrf.mxu0 }
 0x48e   : > { %v3943_v28 = vpop.f32.mrf.mxu0 }
 0x48f   : > { %v1588_v29 = vpack.c.bf16 %v3943_v28, %v3942_v26 }
 0x490   : > { %v1569_v30 = vpop.f32.mrf.mxu0 }
 0x491   : > { %v1587_v31 = vpack.c.bf16 %v1569_v30, %v1566_v27  ;;  %3944 = vmatprep.subr.bf16.mxu1 %v1588_v29 }
 0x492   : > { %3945 = vmatpush3.bf16.msra.mxu1 %v1588_v29 }
 0x493   : > { %3946 = vmatprep.subr.bf16.mxu1 %v1587_v31 }
 0x496   : > { %3947 = vmatpush3.bf16.msra.mxu1 %v1587_v31 }
 0x497   : > { %3948 = vmatprep.subr.bf16.mxu1 %v1586_v32 }
 0x49a   : > { %3949 = vmatpush3.bf16.msra.mxu1 %v1586_v32 }
 0x49b   : > { %3950 = vmatprep.subr.bf16.mxu1 %v1585_v33 }
 0x49e   : > { %3951 = vmatpush3.bf16.msra.mxu1 %v1585_v33 }
 0x49f   : > { %3952 = vmatprep.subr.bf16.mxu1 %v1584_v34 }
 0x4a2   : > { %3953 = vmatpush3.bf16.msra.mxu1 %v1584_v34 }
 0x4a3   : > { %3954 = vmatprep.subr.bf16.mxu1 %v1583_v36 }
 0x4a6   : > { %3955 = vmatpush3.bf16.msra.mxu1 %v1583_v36 }
 0x4a7   : > { %3956 = vmatprep.subr.bf16.mxu1 %v1582_v37 }
 0x4aa   : > { %3957 = vmatpush3.bf16.msra.mxu1 %v1582_v37 }
 0x4ab   : > { %3958 = vmatprep.subr.bf16.mxu1 %v1581_v40 }
 0x4ae   : > { %3959 = vmatpush3.bf16.msra.mxu1 %v1581_v40 }
 0x4af   : > { %3996 = vmatprep.subr.bf16.mxu1 %v4320_v41 }
 0x4b1   : > { %3961 = vmatmul.mubr.bf16.vlgmr.msra.gmra.mxu1 %v4640_v13 }
 0x4b2   : > { %3964 = vmatprep.mubr.bf16.mxu1 %v4643_v14  ;;  %3997 = vmatpush3.bf16.msra.mxu1 %v4320_v41 }
 0x4b3   : > { %3998 = vmatprep.subr.bf16.mxu1 %v4321_v42 }
 0x4b6   : > { %3999 = vmatpush3.bf16.msra.mxu1 %v4321_v42 }
 0x4b9   : > { %3965 = vmatmul.mubr.bf16.gmra.mxu1 %v4648_v15 }
 0x4ba   : > { %3968 = vmatprep.mubr.bf16.mxu1 %v4651_v16 }
 0x4c1   : > { %3969 = vmatmul.mubr.bf16.gmra.mxu1 %v4656_v17 }
 0x4c2   : > { %3972 = vmatprep.mubr.bf16.mxu1 %v4659_v18 }
 0x4c9   : > { %3973 = vmatmul.mubr.bf16.gmra.mxu1 %v4664_v19 }
 0x571   : > { %v3962_v11 = vpop.f32.mrf.mxu1 }
 0x572   : > { %v1640_v25 = vadd.f32 %v3962_v11, %v3484_v20 }
 0x573   : > { %v1631_v12 = vpop.f32.mrf.mxu1 }
 0x574   : > { %v1632_v22 = vadd.f32 %v3484_v20, %v1631_v12  ;;  %v1696_v31 = vmax.f32 %v1640_v25, 0.0 }
 0x575   : > { %v3963_v21 = vpop.f32.mrf.mxu1 }
 0x576   : > { %v1643_v23 = vadd.f32 %v3963_v21, %v3484_v20  ;;  %v1694_v29 = vmax.f32 %v1632_v22, 0.0 }
 0x577   : > { %v1634_v24 = vpop.f32.mrf.mxu1 }
 0x578   : > { %v1635_v26 = vadd.f32 %v3484_v20, %v1634_v24  ;;  %v1697_v27 = vmax.f32 %v1643_v23, 0.0 }
 0x579   : > { %v3966_v28 = vpop.f32.mrf.mxu1 }
 0x57a   : > { %v1695_v30 = vmax.f32 %v1635_v26, 0.0  ;;  %v1711_v34 = vpack.c.bf16 %v1697_v27, %v1696_v31  ;;  %v1656_v41 = vadd.f32 %v3966_v28, %v3484_v20 }
 0x57b   : > { %v1647_v32 = vpop.f32.mrf.mxu1 }
 0x57c   : > { %v1710_v33 = vpack.c.bf16 %v1695_v30, %v1694_v29  ;;  %v1648_v37 = vadd.f32 %v3484_v20, %v1647_v32  ;;  %v1700_v22 = vmax.f32 %v1656_v41, 0.0 }
 0x57d   : > { %v3967_v36 = vpop.f32.mrf.mxu1 }
 0x57e   : > { %v1659_v40 = vadd.f32 %v3967_v36, %v3484_v20  ;;  %3980 = vmatprep.mubr.msk.bf16.mxu0 %vm962_vm0, %v1710_v33  ;;  %4000 = vmatprep.mubr.msk.bf16.mxu1 %vm962_vm0, %v1710_v33  ;;  %v1698_v12 = vmax.f32 %v1648_v37, 0.0 }
 0x57f   : > { %v1650_v42 = vpop.f32.mrf.mxu1  ;;  %3981 = vmatmul.mubr.msk.bf16.vlgmr.msra.gmra.mxu0 %vm962_vm0, %v1711_v34  ;;  %4001 = vmatmul.mubr.msk.bf16.vlgmr.msra.gmra.mxu1 %vm962_vm0, %v1711_v34 }
 0x580   : > { %v1651_v43 = vadd.f32 %v3484_v20, %v1650_v42  ;;  %v1701_v44 = vmax.f32 %v1659_v40, 0.0 }
 0x581   : > { %v3970_v11 = vpop.f32.mrf.mxu1 }
 0x582   : > { %v1699_v21 = vmax.f32 %v1651_v43, 0.0  ;;  %v1713_v24 = vpack.c.bf16 %v1701_v44, %v1700_v22  ;;  %v1672_v28 = vadd.f32 %v3970_v11, %v3484_v20 }
 0x583   : > { %v1663_v23 = vpop.f32.mrf.mxu1 }
 0x584   : > { %v1712_v25 = vpack.c.bf16 %v1699_v21, %v1698_v12  ;;  %v1664_v27 = vadd.f32 %v3484_v20, %v1663_v23  ;;  %v1704_v37 = vmax.f32 %v1672_v28, 0.0  ;;  %v1413_v28 = vadd.f32 %v4785_v45, %v4746_v53 }
 0x585   : > { %v3971_v26 = vpop.f32.mrf.mxu1 }
 0x586   : > { %v1675_v29 = vadd.f32 %v3971_v26, %v3484_v20  ;;  %3984 = vmatprep.mubr.msk.bf16.mxu0 %vm962_vm0, %v1712_v25  ;;  %4004 = vmatprep.mubr.msk.bf16.mxu1 %vm962_vm0, %v1712_v25  ;;  %v1702_v34 = vmax.f32 %v1664_v27, 0.0 }
 0x587   : > { %v1666_v30 = vpop.f32.mrf.mxu1  ;;  %3985 = vmatmul.mubr.msk.bf16.gmra.mxu0 %vm962_vm0, %v1713_v24  ;;  %4005 = vmatmul.mubr.msk.bf16.gmra.mxu1 %vm962_vm0, %v1713_v24 }
 0x588   : > { %v1667_v31 = vadd.f32 %v3484_v20, %v1666_v30  ;;  %v1705_v32 = vmax.f32 %v1675_v29, 0.0 }
 0x589   : > { %v3974_v33 = vpop.f32.mrf.mxu1 }
 0x58a   : > { %v1703_v36 = vmax.f32 %v1667_v31, 0.0  ;;  %v1715_v42 = vpack.c.bf16 %v1705_v32, %v1704_v37  ;;  %v1688_v11 = vadd.f32 %v3974_v33, %v3484_v20  ;;  %v1405_v31 = vadd.f32 %v4787_v46, %v4748_v56 }
 0x58b   : > { %v1679_v40 = vpop.f32.mrf.mxu1  ;;  %v1429_v56 = vadd.f32 %v4793_v49, %v4754_v59 }
 0x58c   : > { %v1714_v41 = vpack.c.bf16 %v1703_v36, %v1702_v34  ;;  %v1680_v44 = vadd.f32 %v3484_v20, %v1679_v40  ;;  %v1708_v26 = vmax.f32 %v1688_v11, 0.0  ;;  %v1416_v36 = vadd.f32 %v4789_v47, %v4750_v57 }
 0x58d   : > { %v3975_v43 = vpop.f32.mrf.mxu1 }
 0x58e   : > { %v1691_v12 = vadd.f32 %v3975_v43, %v3484_v20  ;;  %3988 = vmatprep.mubr.msk.bf16.mxu0 %vm962_vm0, %v1714_v41  ;;  %4008 = vmatprep.mubr.msk.bf16.mxu1 %vm962_vm0, %v1714_v41  ;;  %v1706_v25 = vmax.f32 %v1680_v44, 0.0  ;;  %v1421_v43 = vadd.f32 %v4795_v50, %v4756_v60  ;;  %v1445_v60 = vadd.f32 %v4801_v55, %v4762_v63 }
 0x58f   : > { %v1682_v21 = vpop.f32.mrf.mxu1  ;;  %3989 = vmatmul.mubr.msk.bf16.gmra.mxu0 %vm962_vm0, %v1715_v42  ;;  %4009 = vmatmul.mubr.msk.bf16.gmra.mxu1 %vm962_vm0, %v1715_v42  ;;  %v1440_v63 = vadd.f32 %v4807_v52, %v4768_v2  ;;  %v1464_v2 = vadd.f32 %v4813_v9, %v4774_v5 }
 0x590   : > { %v1683_v22 = vadd.f32 %v3484_v20, %v1682_v21  ;;  %v1709_v23 = vmax.f32 %v1691_v12, 0.0  ;;  %v1432_v12 = vadd.f32 %v4797_v51, %v4758_v61  ;;  %v1437_v61 = vadd.f32 %v4803_v38, %v4764_v0 }
 0x591   : > { %v1461_v0 = vadd.f32 %v4809_v7, %v4770_v3 }
 0x592   : > { %v1707_v24 = vmax.f32 %v1683_v22, 0.0  ;;  %v1717_v29 = vpack.c.bf16 %v1709_v23, %v1708_v26  ;;  %v1424_v23 = vadd.f32 %v4799_v54, %v4760_v62  ;;  %v1448_v62 = vadd.f32 %v4805_v39, %v4766_v1 }
 0x593   : > { %v1453_v1 = vadd.f32 %v4811_v8, %v4772_v4 }
 0x594   : > { %v1716_v27 = vpack.c.bf16 %v1707_v24, %v1706_v25 }
 0x596   : > { %3992 = vmatprep.mubr.msk.bf16.mxu0 %vm962_vm0, %v1716_v27  ;;  %4012 = vmatprep.mubr.msk.bf16.mxu1 %vm962_vm0, %v1716_v27 }
 0x597   : > { %3993 = vmatmul.mubr.msk.bf16.gmra.mxu0 %vm962_vm0, %v1717_v29  ;;  %4013 = vmatmul.mubr.msk.bf16.gmra.mxu1 %vm962_vm0, %v1717_v29 }
 0x598   : > { %4032 = vmatprep.mubr.bf16.mxu0 %v4633_v35 }
 0x63f   : > { %v3982_v20 = vpop.f32.mrf.mxu0  ;;  %v4839_v30 = vpop.f32.mrf.mxu1 }
 0x640   : > { %v4843_v32 = vadd.f32 %v3982_v20, %v1413_v28 }
 0x641   : > { %v1793_v33 = vpop.f32.mrf.mxu0  ;;  %v4845_v34 = vpop.f32.mrf.mxu1 }
 0x642   : > { %v4849_v37 = vadd.f32 %v1793_v33, %v1405_v31 }
 0x643   : > { %v3983_v35 = vpop.f32.mrf.mxu0  ;;  %v4851_v40 = vpop.f32.mrf.mxu1 }
 0x644   : > { %v4853_v53 = vadd.f32 %v3983_v35, %v1416_v36  ;;  %v1987_v9 = vpack.c.bf16 %v4851_v40, %v4839_v30  ;;  %v4326_v30 = vld [vmem:[#allocation6 + $0x38] sm:$0xff]  }
 0x645   : > { %v4855_v45 = vpop.f32.mrf.mxu0  ;;  %v4857_v41 = vpop.f32.mrf.mxu1  ;;  %4048 = vmatprep.subr.bf16.mxu1 %v4326_v30 }
 0x646   : > { %4049 = vmatpush3.bf16.msra.mxu1 %v4326_v30 }
 0x647   : > { %v3986_v46 = vpop.f32.mrf.mxu0  ;;  %v4006_v42 = vpop.f32.mrf.mxu1 }
 0x648   : > { %v4863_v57 = vadd.f32 %v3986_v46, %v1429_v56 }
 0x649   : > { %v1809_v47 = vpop.f32.mrf.mxu0  ;;  %v1939_v44 = vpop.f32.mrf.mxu1 }
 0x64a   : > { %v4867_v11 = vadd.f32 %v1809_v47, %v1421_v43 }
 0x64b   : > { %v3987_v21 = vpop.f32.mrf.mxu0  ;;  %v4007_v22 = vpop.f32.mrf.mxu1 }
 0x64c   : > { %v4871_v59 = vadd.f32 %v3987_v21, %v1432_v12 }
 0x64d   : > { %v1812_v49 = vpop.f32.mrf.mxu0  ;;  %v1942_v25 = vpop.f32.mrf.mxu1 }
 0x64e   : > { %v4875_v50 = vadd.f32 %v1812_v49, %v1424_v23  ;;  %v1989_v23 = vpack.c.bf16 %v4007_v22, %v4006_v42  ;;  %v1988_v5 = vpack.c.bf16 %v1942_v25, %v1939_v44  ;;  %v1986_v49 = vpack.c.bf16 %v4857_v41, %v4845_v34  ;;  %v4327_v34 = vld [vmem:[#allocation6 + $0x30] sm:$0xff]  }
 0x64f   : > { %v3990_v24 = vpop.f32.mrf.mxu0  ;;  %v4010_v26 = vpop.f32.mrf.mxu1  ;;  %4050 = vmatprep.subr.bf16.mxu1 %v4327_v34 }
 0x650   : > { %v4879_v51 = vadd.f32 %v3990_v24, %v1445_v60  ;;  %v4324_v60 = vld [vmem:[#allocation4 + $0x38] sm:$0xff]   ;;  %v4325_v24 = vld [vmem:[#allocation4 + $0x30] sm:$0xff]   ;;  %4051 = vmatpush3.bf16.msra.mxu1 %v4327_v34 }
 0x651   : > { %v1825_v27 = vpop.f32.mrf.mxu0  ;;  %v1955_v29 = vpop.f32.mrf.mxu1 }
 0x652   : > { %v4883_v54 = vadd.f32 %v1825_v27, %v1437_v61 }
 0x653   : > { %v3991_v28 = vpop.f32.mrf.mxu0  ;;  %v4011_v20 = vpop.f32.mrf.mxu1 }
 0x654   : > { %v4887_v55 = vadd.f32 %v3991_v28, %v1448_v62  ;;  %v1991_v4 = vpack.c.bf16 %v4011_v20, %v4010_v26 }
 0x655   : > { %v1828_v31 = vpop.f32.mrf.mxu0  ;;  %v1958_v33 = vpop.f32.mrf.mxu1 }
 0x656   : > { %v4891_v38 = vadd.f32 %v1828_v31, %v1440_v63  ;;  %v1990_v8 = vpack.c.bf16 %v1958_v33, %v1955_v29 }
 0x657   : > { %v3994_v36 = vpop.f32.mrf.mxu0  ;;  %v4014_v35 = vpop.f32.mrf.mxu1 }
 0x658   : > { %v4895_v39 = vadd.f32 %v3994_v36, %v1461_v0 }
 0x659   : > { %v1841_v56 = vpop.f32.mrf.mxu0  ;;  %v1971_v46 = vpop.f32.mrf.mxu1 }
 0x65a   : > { %v4899_v52 = vadd.f32 %v1841_v56, %v1453_v1 }
 0x65b   : > { %v3995_v43 = vpop.f32.mrf.mxu0  ;;  %v4015_v47 = vpop.f32.mrf.mxu1 }
 0x65c   : > { %v4901_v12 = vadd.f32 %v3995_v43, %v1464_v2  ;;  %v1993_v3 = vpack.c.bf16 %v4015_v47, %v4014_v35 }
 0x65d   : > { %v1974_v7 = vpop.f32.mrf.mxu1 }
 0x65e   : > { %v1992_v21 = vpack.c.bf16 %v1974_v7, %v1971_v46  ;;  %4016 = vmatprep.subr.bf16.mxu0 %v1993_v3 }
 0x65f   : > { %4017 = vmatpush3.bf16.msra.mxu0 %v1993_v3 }
 0x660   : > { %4018 = vmatprep.subr.bf16.mxu0 %v1992_v21 }
 0x663   : > { %4019 = vmatpush3.bf16.msra.mxu0 %v1992_v21 }
 0x664   : > { %4020 = vmatprep.subr.bf16.mxu0 %v1991_v4 }
 0x667   : > { %4021 = vmatpush3.bf16.msra.mxu0 %v1991_v4 }
 0x668   : > { %4022 = vmatprep.subr.bf16.mxu0 %v1990_v8 }
 0x66b   : > { %4023 = vmatpush3.bf16.msra.mxu0 %v1990_v8 }
 0x66c   : > { %4024 = vmatprep.subr.bf16.mxu0 %v1989_v23 }
 0x66f   : > { %4025 = vmatpush3.bf16.msra.mxu0 %v1989_v23 }
 0x670   : > { %4026 = vmatprep.subr.bf16.mxu0 %v1988_v5 }
 0x673   : > { %4027 = vmatpush3.bf16.msra.mxu0 %v1988_v5 }
 0x674   : > { %4028 = vmatprep.subr.bf16.mxu0 %v1987_v9 }
 0x677   : > { %4029 = vmatpush3.bf16.msra.mxu0 %v1987_v9 }
 0x678   : > { %4030 = vmatprep.subr.bf16.mxu0 %v1986_v49 }
 0x67b   : > { %4031 = vmatpush3.bf16.msra.mxu0 %v1986_v49 }
 0x67c   : > { %4068 = vmatprep.subr.bf16.mxu0 %v4324_v60 }
 0x67e   : > { %4033 = vmatmul.mubr.bf16.vlgmr.msra.gmra.mxu0 %v4640_v13  ;;  %v4914_v13 = vpop.f32.mrf.mxu0 }
 0x67f   : > { %4036 = vmatprep.mubr.bf16.mxu0 %v4643_v14  ;;  %4069 = vmatpush3.bf16.msra.mxu0 %v4324_v60 }
 0x680   : > { %4070 = vmatprep.subr.bf16.mxu0 %v4325_v24 }
 0x683   : > { %4071 = vmatpush3.bf16.msra.mxu0 %v4325_v24 }
 0x686   : > { %4037 = vmatmul.mubr.bf16.gmra.mxu0 %v4648_v15  ;;  %v3506_v15 = vld [vmem:[%s5203_s6 + $0x2] ss:$0 sm:$0xff] }
 0x687   : > { %4040 = vmatprep.mubr.bf16.mxu0 %v4651_v16 }
 0x68e   : > { %4041 = vmatmul.mubr.bf16.gmra.mxu0 %v4656_v17 }
 0x68f   : > { %4044 = vmatprep.mubr.bf16.mxu0 %v4659_v18 }
 0x696   : > { %4045 = vmatmul.mubr.bf16.gmra.mxu0 %v4664_v19 }
 0x73e   : > { %v4034_v14 = vpop.f32.mrf.mxu0 }
 0x73f   : > { %v2045_v18 = vadd.f32 %v4034_v14, %v3506_v15 }
 0x740   : > { %v2036_v40 = vpop.f32.mrf.mxu0 }
 0x741   : > { %v2037_v17 = vadd.f32 %v3506_v15, %v2036_v40  ;;  %v2101_v61 = vmax.f32 %v2045_v18, 0.0 }
 0x742   : > { %v4035_v16 = vpop.f32.mrf.mxu0 }
 0x743   : > { %v2048_v41 = vadd.f32 %v4035_v16, %v3506_v15  ;;  %v2099_v25 = vmax.f32 %v2037_v17, 0.0 }
 0x744   : > { %v2039_v42 = vpop.f32.mrf.mxu0 }
 0x745   : > { %v2040_v19 = vadd.f32 %v3506_v15, %v2039_v42  ;;  %v2102_v44 = vmax.f32 %v2048_v41, 0.0 }
 0x746   : > { %v4038_v22 = vpop.f32.mrf.mxu0 }
 0x747   : > { %v2100_v26 = vmax.f32 %v2040_v19, 0.0  ;;  %v2116_v62 = vpack.c.bf16 %v2102_v44, %v2101_v61  ;;  %v2061_v31 = vadd.f32 %v4038_v22, %v3506_v15 }
 0x748   : > { %v2052_v27 = vpop.f32.mrf.mxu0 }
 0x749   : > { %v2115_v29 = vpack.c.bf16 %v2100_v26, %v2099_v25  ;;  %v2053_v20 = vadd.f32 %v3506_v15, %v2052_v27  ;;  %v2105_v46 = vmax.f32 %v2061_v31, 0.0  ;;  %v4936_v27 = vld [vmem:[%s4617_s24] sm:$0xff]  }
 0x74a   : > { %v4039_v28 = vpop.f32.mrf.mxu0 }
 0x74b   : > { %v2064_v63 = vadd.f32 %v4039_v28, %v3506_v15  ;;  %4052 = vmatprep.mubr.msk.bf16.mxu1 %vm962_vm0, %v2115_v29  ;;  %4072 = vmatprep.mubr.msk.bf16.mxu0 %vm962_vm0, %v2115_v29  ;;  %v2103_v1 = vmax.f32 %v2053_v20, 0.0 }
 0x74c   : > { %v2055_v33 = vpop.f32.mrf.mxu0  ;;  %4053 = vmatmul.mubr.msk.bf16.vlgmr.msra.gmra.mxu1 %vm962_vm0, %v2116_v62  ;;  %4073 = vmatmul.mubr.msk.bf16.vlgmr.msra.gmra.mxu0 %vm962_vm0, %v2116_v62 }
 0x74d   : > { %v2056_v0 = vadd.f32 %v3506_v15, %v2055_v33  ;;  %v2106_v36 = vmax.f32 %v2064_v63, 0.0  ;;  %v1408_v63 = vadd.f32 %v4791_v48, %v4752_v58 }
 0x74e   : > { %v4042_v35 = vpop.f32.mrf.mxu0 }
 0x74f   : > { %v2104_v56 = vmax.f32 %v2056_v0, 0.0  ;;  %v2118_v47 = vpack.c.bf16 %v2106_v36, %v2105_v46  ;;  %v2077_v4 = vadd.f32 %v4042_v35, %v3506_v15  ;;  %v1857_v36 = vadd.f32 %v4855_v45, %v1408_v63  ;;  %v5017_v63 = vld [vmem:[%s4617_s24 + $0x38] sm:$0xff]  }
 0x750   : > { %v2068_v2 = vpop.f32.mrf.mxu0 }
 0x751   : > { %v2117_v43 = vpack.c.bf16 %v2104_v56, %v2103_v1  ;;  %v2069_v7 = vadd.f32 %v3506_v15, %v2068_v2  ;;  %v2109_v24 = vmax.f32 %v2077_v4, 0.0 }
 0x752   : > { %v4043_v3 = vpop.f32.mrf.mxu0 }
 0x753   : > { %v2080_v21 = vadd.f32 %v4043_v3, %v3506_v15  ;;  %4056 = vmatprep.mubr.msk.bf16.mxu1 %vm962_vm0, %v2117_v43  ;;  %4076 = vmatprep.mubr.msk.bf16.mxu0 %vm962_vm0, %v2117_v43  ;;  %v2107_v49 = vmax.f32 %v2069_v7, 0.0 }
 0x754   : > { %v2071_v8 = vpop.f32.mrf.mxu0  ;;  %4057 = vmatmul.mubr.msk.bf16.gmra.mxu1 %vm962_vm0, %v2118_v47  ;;  %4077 = vmatmul.mubr.msk.bf16.gmra.mxu0 %vm962_vm0, %v2118_v47 }
 0x755   : > { %v2072_v23 = vadd.f32 %v3506_v15, %v2071_v8  ;;  %v2110_v5 = vmax.f32 %v2080_v21, 0.0 }
 0x756   : > { %v4046_v9 = vpop.f32.mrf.mxu0 }
 0x757   : > { %v2108_v60 = vmax.f32 %v2072_v23, 0.0  ;;  %v2120_v14 = vpack.c.bf16 %v2110_v5, %v2109_v24  ;;  %v2093_v41 = vadd.f32 %v4046_v9, %v3506_v15 }
 0x758   : > { %v2084_v30 = vpop.f32.mrf.mxu0 }
 0x759   : > { %v2119_v34 = vpack.c.bf16 %v2108_v60, %v2107_v49  ;;  %v2085_v16 = vadd.f32 %v3506_v15, %v2084_v30  ;;  %v2113_v25 = vmax.f32 %v2093_v41, 0.0 }
 0x75a   : > { %v4047_v40 = vpop.f32.mrf.mxu0 }
 0x75b   : > { %v2096_v17 = vadd.f32 %v4047_v40, %v3506_v15  ;;  %4060 = vmatprep.mubr.msk.bf16.mxu1 %vm962_vm0, %v2119_v34  ;;  %4080 = vmatprep.mubr.msk.bf16.mxu0 %vm962_vm0, %v2119_v34  ;;  %v2111_v44 = vmax.f32 %v2085_v16, 0.0 }
 0x75c   : > { %v2087_v18 = vpop.f32.mrf.mxu0  ;;  %4061 = vmatmul.mubr.msk.bf16.gmra.mxu1 %vm962_vm0, %v2120_v14  ;;  %4081 = vmatmul.mubr.msk.bf16.gmra.mxu0 %vm962_vm0, %v2120_v14 }
 0x75d   : > { %v2088_v42 = vadd.f32 %v3506_v15, %v2087_v18  ;;  %v2114_v19 = vmax.f32 %v2096_v17, 0.0 }
 0x75f   : > { %v2112_v22 = vmax.f32 %v2088_v42, 0.0  ;;  %v2122_v61 = vpack.c.bf16 %v2114_v19, %v2113_v25  ;;  %v4329_v25 = vld [vmem:[#allocation4 + $0x40] sm:$0xff]  }
 0x761   : > { %v2121_v26 = vpack.c.bf16 %v2112_v22, %v2111_v44  ;;  %v4328_v22 = vld [vmem:[#allocation4 + $0x48] sm:$0xff]  }
 0x763   : > { %4064 = vmatprep.mubr.msk.bf16.mxu1 %vm962_vm0, %v2121_v26  ;;  %4084 = vmatprep.mubr.msk.bf16.mxu0 %vm962_vm0, %v2121_v26  ;;  %v4993_v26 = vld [vmem:[%s4617_s24 + $0x8] sm:$0xff]  }
 0x764   : > { %4065 = vmatmul.mubr.msk.bf16.gmra.mxu1 %vm962_vm0, %v2122_v61  ;;  %4085 = vmatmul.mubr.msk.bf16.gmra.mxu0 %vm962_vm0, %v2122_v61  ;;  %v4997_v61 = vld [vmem:[%s4617_s24 + $0x10] sm:$0xff]  }
 0x765   : > { %4104 = vmatprep.mubr.bf16.mxu1 %v4936_v27 }
 0x80c   : > { %v4054_v29 = vpop.f32.mrf.mxu1  ;;  %v4939_v15 = vpop.f32.mrf.mxu0 }
 0x80d   : > { %v4942_v62 = vadd.f32 %v4054_v29, %v4843_v32  ;;  %v5001_v29 = vld [vmem:[%s4617_s24 + $0x18] sm:$0xff]  }
 0x80e   : > { %v2198_v28 = vpop.f32.mrf.mxu1  ;;  %v4944_v20 = vpop.f32.mrf.mxu0 }
 0x80f   : > { %v4949_v31 = vadd.f32 %v2198_v28, %v4849_v37  ;;  %v5009_v28 = vld [vmem:[%s4617_s24 + $0x28] sm:$0xff]  }
 0x810   : > { %v4055_v33 = vpop.f32.mrf.mxu1  ;;  %v4075_v0 = vpop.f32.mrf.mxu0 }
 0x811   : > { %v4953_v35 = vadd.f32 %v4055_v33, %v4853_v53  ;;  %v4330_v33 = vld [vmem:[#allocation6 + $0x48] sm:$0xff]  }
 0x812   : > { %v2201_v1 = vpop.f32.mrf.mxu1  ;;  %v2331_v56 = vpop.f32.mrf.mxu0  ;;  %4120 = vmatprep.subr.bf16.mxu0 %v4330_v33 }
 0x813   : > { %v4955_v32 = vadd.f32 %v2201_v1, %v1857_v36  ;;  %v2391_v44 = vpack.c.bf16 %v2331_v56, %v4944_v20  ;;  %v5013_v20 = vld [vmem:[%s4617_s24 + $0x30] sm:$0xff]   ;;  %4121 = vmatpush3.bf16.msra.mxu0 %v4330_v33 }
 0x814   : > { %v4058_v46 = vpop.f32.mrf.mxu1  ;;  %v4078_v2 = vpop.f32.mrf.mxu0 }
 0x815   : > { %v4958_v43 = vadd.f32 %v4058_v46, %v4863_v57  ;;  %v3528_v46 = vld [vmem:[%s5203_s6 + $0x3] ss:$0 sm:$0xff] }
 0x816   : > { %v2214_v58 = vpop.f32.mrf.mxu1  ;;  %v2344_v48 = vpop.f32.mrf.mxu0 }
 0x817   : > { %v4961_v37 = vadd.f32 %v2214_v58, %v4867_v11 }
 0x818   : > { %v4059_v47 = vpop.f32.mrf.mxu1  ;;  %v4079_v3 = vpop.f32.mrf.mxu0 }
 0x819   : > { %v4964_v45 = vadd.f32 %v4059_v47, %v4871_v59  ;;  %v2394_v19 = vpack.c.bf16 %v4079_v3, %v4078_v2 }
 0x81a   : > { %v2217_v53 = vpop.f32.mrf.mxu1  ;;  %v2347_v7 = vpop.f32.mrf.mxu0 }
 0x81b   : > { %v4967_v21 = vadd.f32 %v2217_v53, %v4875_v50 }
 0x81c   : > { %v4062_v4 = vpop.f32.mrf.mxu1  ;;  %v4082_v8 = vpop.f32.mrf.mxu0 }
 0x81d   : > { %v4970_v57 = vadd.f32 %v4062_v4, %v4879_v51 }
 0x81e   : > { %v2230_v23 = vpop.f32.mrf.mxu1  ;;  %v2360_v5 = vpop.f32.mrf.mxu0 }
 0x81f   : > { %v4973_v11 = vadd.f32 %v2230_v23, %v4883_v54 }
 0x820   : > { %v4063_v9 = vpop.f32.mrf.mxu1  ;;  %v4083_v49 = vpop.f32.mrf.mxu0 }
 0x821   : > { %v4976_v59 = vadd.f32 %v4063_v9, %v4887_v55 }
 0x822   : > { %v2233_v60 = vpop.f32.mrf.mxu1  ;;  %v2363_v24 = vpop.f32.mrf.mxu0 }
 0x823   : > { %v4979_v50 = vadd.f32 %v2233_v60, %v4891_v38  ;;  %v2396_v38 = vpack.c.bf16 %v4083_v49, %v4082_v8 }
 0x824   : > { %v4066_v30 = vpop.f32.mrf.mxu1  ;;  %v4086_v34 = vpop.f32.mrf.mxu0 }
 0x825   : > { %v4982_v51 = vadd.f32 %v4066_v30, %v4895_v39  ;;  %v2395_v39 = vpack.c.bf16 %v2363_v24, %v2360_v5 }
 0x826   : > { %v2246_v14 = vpop.f32.mrf.mxu1  ;;  %v2376_v40 = vpop.f32.mrf.mxu0 }
 0x827   : > { %v4985_v54 = vadd.f32 %v2246_v14, %v4899_v52  ;;  %v2393_v52 = vpack.c.bf16 %v2347_v7, %v2344_v48 }
 0x828   : > { %v4067_v16 = vpop.f32.mrf.mxu1  ;;  %v4087_v17 = vpop.f32.mrf.mxu0 }
 0x829   : > { %v4988_v55 = vadd.f32 %v4067_v16, %v4901_v12  ;;  %v2398_v41 = vpack.c.bf16 %v4087_v17, %v4086_v34  ;;  %v2392_v12 = vpack.c.bf16 %v4075_v0, %v4939_v15  ;;  %v5005_v15 = vld [vmem:[%s4617_s24 + $0x20] sm:$0xff]  }
 0x82a   : > { %v2379_v18 = vpop.f32.mrf.mxu0  ;;  %v4331_v0 = vld [vmem:[#allocation6 + $0x40] sm:$0xff]   ;;  %v5020_v36 = vpop.f32.mrf.mxu1 }
 0x82b   : > { %v2397_v42 = vpack.c.bf16 %v2379_v18, %v2376_v40  ;;  %4088 = vmatprep.subr.bf16.mxu1 %v2398_v41  ;;  %4122 = vmatprep.subr.bf16.mxu0 %v4331_v0 }
 0x82c   : > { %4089 = vmatpush3.bf16.msra.mxu1 %v2398_v41  ;;  %4123 = vmatpush3.bf16.msra.mxu0 %v4331_v0 }
 0x82d   : > { %4090 = vmatprep.subr.bf16.mxu1 %v2397_v42 }
 0x830   : > { %4091 = vmatpush3.bf16.msra.mxu1 %v2397_v42 }
 0x831   : > { %4092 = vmatprep.subr.bf16.mxu1 %v2396_v38 }
 0x834   : > { %4093 = vmatpush3.bf16.msra.mxu1 %v2396_v38 }
 0x835   : > { %4094 = vmatprep.subr.bf16.mxu1 %v2395_v39 }
 0x838   : > { %4095 = vmatpush3.bf16.msra.mxu1 %v2395_v39 }
 0x839   : > { %4096 = vmatprep.subr.bf16.mxu1 %v2394_v19 }
 0x83c   : > { %4097 = vmatpush3.bf16.msra.mxu1 %v2394_v19 }
 0x83d   : > { %4098 = vmatprep.subr.bf16.mxu1 %v2393_v52 }
 0x840   : > { %4099 = vmatpush3.bf16.msra.mxu1 %v2393_v52 }
 0x841   : > { %4100 = vmatprep.subr.bf16.mxu1 %v2392_v12 }
 0x844   : > { %4101 = vmatpush3.bf16.msra.mxu1 %v2392_v12 }
 0x845   : > { %4102 = vmatprep.subr.bf16.mxu1 %v2391_v44 }
 0x848   : > { %4103 = vmatpush3.bf16.msra.mxu1 %v2391_v44 }
 0x849   : > { %4140 = vmatprep.subr.bf16.mxu1 %v4328_v22 }
 0x84b   : > { %4105 = vmatmul.mubr.bf16.vlgmr.msra.gmra.mxu1 %v4993_v26 }
 0x84c   : > { %4108 = vmatprep.mubr.bf16.mxu1 %v4997_v61  ;;  %4141 = vmatpush3.bf16.msra.mxu1 %v4328_v22 }
 0x84d   : > { %4142 = vmatprep.subr.bf16.mxu1 %v4329_v25 }
 0x850   : > { %4143 = vmatpush3.bf16.msra.mxu1 %v4329_v25 }
 0x853   : > { %4109 = vmatmul.mubr.bf16.gmra.mxu1 %v5001_v29 }
 0x854   : > { %4112 = vmatprep.mubr.bf16.mxu1 %v5005_v15 }
 0x85b   : > { %4113 = vmatmul.mubr.bf16.gmra.mxu1 %v5009_v28 }
 0x85c   : > { %4116 = vmatprep.mubr.bf16.mxu1 %v5013_v20 }
 0x863   : > { %4117 = vmatmul.mubr.bf16.gmra.mxu1 %v5017_v63 }
 0x90b   : > { %v4106_v1 = vpop.f32.mrf.mxu1 }
 0x90c   : > { %v2450_v47 = vadd.f32 %v4106_v1, %v3528_v46 }
 0x90d   : > { %v2441_v56 = vpop.f32.mrf.mxu1 }
 0x90e   : > { %v2442_v58 = vadd.f32 %v3528_v46, %v2441_v56  ;;  %v2506_v5 = vmax.f32 %v2450_v47, 0.0 }
 0x90f   : > { %v4107_v2 = vpop.f32.mrf.mxu1 }
 0x910   : > { %v2453_v48 = vadd.f32 %v4107_v2, %v3528_v46  ;;  %v2504_v8 = vmax.f32 %v2442_v58, 0.0 }
 0x911   : > { %v2444_v3 = vpop.f32.mrf.mxu1 }
 0x912   : > { %v2445_v53 = vadd.f32 %v3528_v46, %v2444_v3  ;;  %v2507_v7 = vmax.f32 %v2453_v48, 0.0 }
 0x913   : > { %v4110_v4 = vpop.f32.mrf.mxu1 }
 0x914   : > { %v2505_v23 = vmax.f32 %v2445_v53, 0.0  ;;  %v2521_v60 = vpack.c.bf16 %v2507_v7, %v2506_v5  ;;  %v2466_v14 = vadd.f32 %v4110_v4, %v3528_v46 }
 0x915   : > { %v2457_v9 = vpop.f32.mrf.mxu1 }
 0x916   : > { %v2520_v49 = vpack.c.bf16 %v2505_v23, %v2504_v8  ;;  %v2458_v30 = vadd.f32 %v3528_v46, %v2457_v9  ;;  %v2510_v38 = vmax.f32 %v2466_v14, 0.0 }
 0x917   : > { %v4111_v24 = vpop.f32.mrf.mxu1 }
 0x918   : > { %v2469_v34 = vadd.f32 %v4111_v24, %v3528_v46  ;;  %4124 = vmatprep.mubr.msk.bf16.mxu0 %vm962_vm0, %v2520_v49  ;;  %4144 = vmatprep.mubr.msk.bf16.mxu1 %vm962_vm0, %v2520_v49  ;;  %v2508_v18 = vmax.f32 %v2458_v30, 0.0 }
 0x919   : > { %v2460_v40 = vpop.f32.mrf.mxu1  ;;  %4125 = vmatmul.mubr.msk.bf16.vlgmr.msra.gmra.mxu0 %vm962_vm0, %v2521_v60  ;;  %4145 = vmatmul.mubr.msk.bf16.vlgmr.msra.gmra.mxu1 %vm962_vm0, %v2521_v60 }
 0x91a   : > { %v2461_v16 = vadd.f32 %v3528_v46, %v2460_v40  ;;  %v2511_v17 = vmax.f32 %v2469_v34, 0.0  ;;  %v4332_v40 = vld [vmem:[#allocation6 + $0x58] sm:$0xff]  }
 0x91b   : > { %v4114_v41 = vpop.f32.mrf.mxu1  ;;  %4192 = vmatprep.subr.bf16.mxu1 %v4332_v40 }
 0x91c   : > { %v2509_v42 = vmax.f32 %v2461_v16, 0.0  ;;  %v2523_v52 = vpack.c.bf16 %v2511_v17, %v2510_v38  ;;  %v2482_v25 = vadd.f32 %v4114_v41, %v3528_v46  ;;  %v4333_v16 = vld [vmem:[#allocation6 + $0x50] sm:$0xff]   ;;  %4193 = vmatpush3.bf16.msra.mxu1 %v4332_v40 }
 0x91d   : > { %v2473_v39 = vpop.f32.mrf.mxu1  ;;  %4194 = vmatprep.subr.bf16.mxu1 %v4333_v16 }
 0x91e   : > { %v2522_v19 = vpack.c.bf16 %v2509_v42, %v2508_v18  ;;  %v2474_v44 = vadd.f32 %v3528_v46, %v2473_v39  ;;  %v2514_v48 = vmax.f32 %v2482_v25, 0.0 }
 0x91f   : > { %v4115_v12 = vpop.f32.mrf.mxu1 }
 0x920   : > { %v2485_v22 = vadd.f32 %v4115_v12, %v3528_v46  ;;  %4128 = vmatprep.mubr.msk.bf16.mxu0 %vm962_vm0, %v2522_v19  ;;  %4148 = vmatprep.mubr.msk.bf16.mxu1 %vm962_vm0, %v2522_v19  ;;  %v2512_v2 = vmax.f32 %v2474_v44, 0.0 }
 0x921   : > { %v2476_v33 = vpop.f32.mrf.mxu1  ;;  %4129 = vmatmul.mubr.msk.bf16.gmra.mxu0 %vm962_vm0, %v2523_v52  ;;  %4149 = vmatmul.mubr.msk.bf16.gmra.mxu1 %vm962_vm0, %v2523_v52 }
 0x922   : > { %v2477_v0 = vadd.f32 %v3528_v46, %v2476_v33  ;;  %v2515_v1 = vmax.f32 %v2485_v22, 0.0  ;;  %4195 = vmatpush3.bf16.msra.mxu1 %v4333_v16 }
 0x923   : > { %v4118_v56 = vpop.f32.mrf.mxu1 }
 0x924   : > { %v2513_v58 = vmax.f32 %v2477_v0, 0.0  ;;  %v2525_v53 = vpack.c.bf16 %v2515_v1, %v2514_v48  ;;  %v2498_v23 = vadd.f32 %v4118_v56, %v3528_v46 }
 0x925   : > { %v2489_v47 = vpop.f32.mrf.mxu1 }
 0x926   : > { %v2524_v3 = vpack.c.bf16 %v2513_v58, %v2512_v2  ;;  %v2490_v4 = vadd.f32 %v3528_v46, %v2489_v47  ;;  %v2518_v30 = vmax.f32 %v2498_v23, 0.0 }
 0x927   : > { %v4119_v7 = vpop.f32.mrf.mxu1 }
 0x928   : > { %v2501_v8 = vadd.f32 %v4119_v7, %v3528_v46  ;;  %4132 = vmatprep.mubr.msk.bf16.mxu0 %vm962_vm0, %v2524_v3  ;;  %4152 = vmatprep.mubr.msk.bf16.mxu1 %vm962_vm0, %v2524_v3  ;;  %v2516_v60 = vmax.f32 %v2490_v4, 0.0 }
 0x929   : > { %v2492_v5 = vpop.f32.mrf.mxu1  ;;  %4133 = vmatmul.mubr.msk.bf16.gmra.mxu0 %vm962_vm0, %v2525_v53  ;;  %4153 = vmatmul.mubr.msk.bf16.gmra.mxu1 %vm962_vm0, %v2525_v53 }
 0x92a   : > { %v2493_v9 = vadd.f32 %v3528_v46, %v2492_v5  ;;  %v2519_v49 = vmax.f32 %v2501_v8, 0.0 }
 0x92c   : > { %v2517_v24 = vmax.f32 %v2493_v9, 0.0  ;;  %v2527_v14 = vpack.c.bf16 %v2519_v49, %v2518_v30 }
 0x92e   : > { %v2526_v34 = vpack.c.bf16 %v2517_v24, %v2516_v60 }
 0x930   : > { %4136 = vmatprep.mubr.msk.bf16.mxu0 %vm962_vm0, %v2526_v34  ;;  %4156 = vmatprep.mubr.msk.bf16.mxu1 %vm962_vm0, %v2526_v34 }
 0x931   : > { %4137 = vmatmul.mubr.msk.bf16.gmra.mxu0 %vm962_vm0, %v2527_v14  ;;  %4157 = vmatmul.mubr.msk.bf16.gmra.mxu1 %vm962_vm0, %v2527_v14 }
 0x932   : > { %4176 = vmatprep.mubr.bf16.mxu0 %v4936_v27 }
 0x9d9   : > { %v4126_v46 = vpop.f32.mrf.mxu0  ;;  %v4146_v17 = vpop.f32.mrf.mxu1 }
 0x9da   : > { %v5043_v41 = vadd.f32 %v4126_v46, %v4942_v62 }
 0x9db   : > { %v2603_v18 = vpop.f32.mrf.mxu0  ;;  %v2733_v42 = vpop.f32.mrf.mxu1 }
 0x9dc   : > { %v5046_v38 = vadd.f32 %v2603_v18, %v4949_v31 }
 0x9dd   : > { %v4127_v39 = vpop.f32.mrf.mxu0  ;;  %v4147_v19 = vpop.f32.mrf.mxu1 }
 0x9de   : > { %v5049_v27 = vadd.f32 %v4127_v39, %v4953_v35 }
 0x9df   : > { %v2606_v52 = vpop.f32.mrf.mxu0  ;;  %v2736_v12 = vpop.f32.mrf.mxu1 }
 0x9e0   : > { %v5052_v44 = vadd.f32 %v2606_v52, %v4955_v32  ;;  %v2796_v46 = vpack.c.bf16 %v2736_v12, %v2733_v42 }
 0x9e1   : > { %v4130_v22 = vpop.f32.mrf.mxu0  ;;  %v4150_v25 = vpop.f32.mrf.mxu1 }
 0x9e2   : > { %v5055_v62 = vadd.f32 %v4130_v22, %v4958_v43 }
 0x9e3   : > { %v2619_v33 = vpop.f32.mrf.mxu0  ;;  %v2749_v0 = vpop.f32.mrf.mxu1 }
 0x9e4   : > { %v5058_v31 = vadd.f32 %v2619_v33, %v4961_v37 }
 0x9e5   : > { %v4131_v1 = vpop.f32.mrf.mxu0  ;;  %v4151_v56 = vpop.f32.mrf.mxu1 }
 0x9e6   : > { %v5061_v35 = vadd.f32 %v4131_v1, %v4964_v45  ;;  %v2799_v16 = vpack.c.bf16 %v4151_v56, %v4150_v25 }
 0x9e7   : > { %v2622_v2 = vpop.f32.mrf.mxu0  ;;  %v2752_v58 = vpop.f32.mrf.mxu1 }
 0x9e8   : > { %v5064_v32 = vadd.f32 %v2622_v2, %v4967_v21 }
 0x9e9   : > { %v4134_v48 = vpop.f32.mrf.mxu0  ;;  %v4154_v47 = vpop.f32.mrf.mxu1 }
 0x9ea   : > { %v5067_v43 = vadd.f32 %v4134_v48, %v4970_v57 }
 0x9eb   : > { %v2635_v3 = vpop.f32.mrf.mxu0  ;;  %v2765_v53 = vpop.f32.mrf.mxu1 }
 0x9ec   : > { %v5070_v37 = vadd.f32 %v2635_v3, %v4973_v11 }
 0x9ed   : > { %v4135_v7 = vpop.f32.mrf.mxu0  ;;  %v4155_v4 = vpop.f32.mrf.mxu1 }
 0x9ee   : > { %v5073_v45 = vadd.f32 %v4135_v7, %v4976_v59 }
 0x9ef   : > { %v2638_v8 = vpop.f32.mrf.mxu0  ;;  %v2768_v23 = vpop.f32.mrf.mxu1 }
 0x9f0   : > { %v5076_v21 = vadd.f32 %v2638_v8, %v4979_v50  ;;  %v2801_v50 = vpack.c.bf16 %v4155_v4, %v4154_v47 }
 0x9f1   : > { %v4138_v5 = vpop.f32.mrf.mxu0  ;;  %v4158_v9 = vpop.f32.mrf.mxu1 }
 0x9f2   : > { %v5079_v57 = vadd.f32 %v4138_v5, %v4982_v51  ;;  %v2800_v51 = vpack.c.bf16 %v2768_v23, %v2765_v53 }
 0x9f3   : > { %v2651_v49 = vpop.f32.mrf.mxu0  ;;  %v2781_v60 = vpop.f32.mrf.mxu1 }
 0x9f4   : > { %v5082_v11 = vadd.f32 %v2651_v49, %v4985_v54  ;;  %v2798_v54 = vpack.c.bf16 %v2752_v58, %v2749_v0 }
 0x9f5   : > { %v4139_v24 = vpop.f32.mrf.mxu0  ;;  %v4159_v30 = vpop.f32.mrf.mxu1 }
 0x9f6   : > { %v5085_v59 = vadd.f32 %v4139_v24, %v4988_v55  ;;  %v2803_v34 = vpack.c.bf16 %v4159_v30, %v4158_v9  ;;  %v2797_v55 = vpack.c.bf16 %v4147_v19, %v4146_v17 }
 0x9f7   : > { %v2784_v14 = vpop.f32.mrf.mxu1  ;;  %v5094_v17 = vpop.f32.mrf.mxu0 }
 0x9f8   : > { %v2802_v40 = vpack.c.bf16 %v2784_v14, %v2781_v60  ;;  %4160 = vmatprep.subr.bf16.mxu0 %v2803_v34 }
 0x9f9   : > { %4161 = vmatpush3.bf16.msra.mxu0 %v2803_v34 }
 0x9fa   : > { %4162 = vmatprep.subr.bf16.mxu0 %v2802_v40 }
 0x9fd   : > { %4163 = vmatpush3.bf16.msra.mxu0 %v2802_v40 }
 0x9fe   : > { %4164 = vmatprep.subr.bf16.mxu0 %v2801_v50 }
 0xa01   : > { %4165 = vmatpush3.bf16.msra.mxu0 %v2801_v50 }
 0xa02   : > { %4166 = vmatprep.subr.bf16.mxu0 %v2800_v51 }
 0xa05   : > { %4167 = vmatpush3.bf16.msra.mxu0 %v2800_v51 }
 0xa06   : > { %4168 = vmatprep.subr.bf16.mxu0 %v2799_v16 }
 0xa09   : > { %4169 = vmatpush3.bf16.msra.mxu0 %v2799_v16 }
 0xa0a   : > { %4170 = vmatprep.subr.bf16.mxu0 %v2798_v54 }
 0xa0d   : > { %4171 = vmatpush3.bf16.msra.mxu0 %v2798_v54 }
 0xa0e   : > { %4172 = vmatprep.subr.bf16.mxu0 %v2797_v55 }
 0xa11   : > { %4173 = vmatpush3.bf16.msra.mxu0 %v2797_v55 }
 0xa12   : > { %4174 = vmatprep.subr.bf16.mxu0 %v2796_v46 }
 0xa15   : > { %4175 = vmatpush3.bf16.msra.mxu0 %v2796_v46 }
 0xa18   : > { %4177 = vmatmul.mubr.bf16.vlgmr.msra.gmra.mxu0 %v4993_v26  ;;  %v3550_v26 = vld [vmem:[%s5203_s6 + $0x4] ss:$0 sm:$0xff] }
 0xa19   : > { %4180 = vmatprep.mubr.bf16.mxu0 %v4997_v61 }
 0xa20   : > { %4181 = vmatmul.mubr.bf16.gmra.mxu0 %v5001_v29 }
 0xa21   : > { %4184 = vmatprep.mubr.bf16.mxu0 %v5005_v15 }
 0xa28   : > { %4185 = vmatmul.mubr.bf16.gmra.mxu0 %v5009_v28 }
 0xa29   : > { %4188 = vmatprep.mubr.bf16.mxu0 %v5013_v20 }
 0xa30   : > { %4189 = vmatmul.mubr.bf16.gmra.mxu0 %v5017_v63 }
 0xad8   : > { %v4178_v18 = vpop.f32.mrf.mxu0 }
 0xad9   : > { %v2855_v29 = vadd.f32 %v4178_v18, %v3550_v26 }
 0xada   : > { %v2846_v42 = vpop.f32.mrf.mxu0 }
 0xadb   : > { %v2847_v61 = vadd.f32 %v3550_v26, %v2846_v42  ;;  %v2911_v25 = vmax.f32 %v2855_v29, 0.0 }
 0xadc   : > { %v4179_v39 = vpop.f32.mrf.mxu0 }
 0xadd   : > { %v2858_v19 = vadd.f32 %v4179_v39, %v3550_v26  ;;  %v2909_v22 = vmax.f32 %v2847_v61, 0.0 }
 0xade   : > { %v2849_v52 = vpop.f32.mrf.mxu0 }
 0xadf   : > { %v2850_v15 = vadd.f32 %v3550_v26, %v2849_v52  ;;  %v2912_v12 = vmax.f32 %v2858_v19, 0.0 }
 0xae0   : > { %v4182_v28 = vpop.f32.mrf.mxu0 }
 0xae1   : > { %v2910_v20 = vmax.f32 %v2850_v15, 0.0  ;;  %v2926_v0 = vpack.c.bf16 %v2912_v12, %v2911_v25  ;;  %v2871_v58 = vadd.f32 %v4182_v28, %v3550_v26 }
 0xae2   : > { %v2862_v63 = vpop.f32.mrf.mxu0 }
 0xae3   : > { %v2925_v33 = vpack.c.bf16 %v2910_v20, %v2909_v22  ;;  %v2863_v56 = vadd.f32 %v3550_v26, %v2862_v63  ;;  %v2915_v8 = vmax.f32 %v2871_v58, 0.0  ;;  %v4448_v63 = vmov 0.0  }
 0xae4   : > { %v4183_v1 = vpop.f32.mrf.mxu0  ;;  %4212 = vmatprep.subr.bf16.mxu0 %v4448_v63  ;;  %4232 = vmatprep.subr.bf16.mxu1 %v4448_v63 }
 0xae5   : > { %v2874_v2 = vadd.f32 %v4183_v1, %v3550_v26  ;;  %4196 = vmatprep.mubr.msk.bf16.mxu1 %vm962_vm0, %v2925_v33  ;;  %v2913_v7 = vmax.f32 %v2863_v56, 0.0  ;;  %4228 = vmatprep.mubr.msk.bf16.mxu0 %vm4449_vm1, %v4448_v63  ;;  %v4336_v33 = vld [vmem:[%s5206_s9 + $0x30] sm:$0xff]   ;;  %v4338_v1 = vld [vmem:[%s5206_s9 + $0x20] sm:$0xff]   ;;  %v4339_v56 = vld [vmem:[%s5206_s9 + $0x18] sm:$0xff]  }
 0xae6   : > { %v2865_v48 = vpop.f32.mrf.mxu0  ;;  %4197 = vmatmul.mubr.msk.bf16.vlgmr.msra.gmra.mxu1 %vm962_vm0, %v2926_v0  ;;  %v4337_v0 = vld [vmem:[%s5206_s9 + $0x28] sm:$0xff]  }
 0xae7   : > { %v2866_v47 = vadd.f32 %v3550_v26, %v2865_v48  ;;  %v2916_v3 = vmax.f32 %v2874_v2, 0.0 }
 0xae8   : > { %v4186_v53 = vpop.f32.mrf.mxu0 }
 0xae9   : > { %v2914_v4 = vmax.f32 %v2866_v47, 0.0  ;;  %v2928_v9 = vpack.c.bf16 %v2916_v3, %v2915_v8  ;;  %v2887_v30 = vadd.f32 %v4186_v53, %v3550_v26 }
 0xaea   : > { %v2878_v23 = vpop.f32.mrf.mxu0 }
 0xaeb   : > { %v2927_v5 = vpack.c.bf16 %v2914_v4, %v2913_v7  ;;  %v2879_v60 = vadd.f32 %v3550_v26, %v2878_v23  ;;  %v2919_v54 = vmax.f32 %v2887_v30, 0.0 }
 0xaec   : > { %v4187_v49 = vpop.f32.mrf.mxu0 }
 0xaed   : > { %v2890_v24 = vadd.f32 %v4187_v49, %v3550_v26  ;;  %4200 = vmatprep.mubr.msk.bf16.mxu1 %vm962_vm0, %v2927_v5  ;;  %v2917_v51 = vmax.f32 %v2879_v60, 0.0 }
 0xaee   : > { %v2881_v34 = vpop.f32.mrf.mxu0  ;;  %4201 = vmatmul.mubr.msk.bf16.gmra.mxu1 %vm962_vm0, %v2928_v9 }
 0xaef   : > { %v2882_v14 = vadd.f32 %v3550_v26, %v2881_v34  ;;  %v2920_v40 = vmax.f32 %v2890_v24, 0.0 }
 0xaf0   : > { %v4190_v50 = vpop.f32.mrf.mxu0 }
 0xaf1   : > { %v2918_v16 = vmax.f32 %v2882_v14, 0.0  ;;  %v2930_v18 = vpack.c.bf16 %v2920_v40, %v2919_v54  ;;  %v2903_v19 = vadd.f32 %v4190_v50, %v3550_v26 }
 0xaf2   : > { %v2894_v55 = vpop.f32.mrf.mxu0 }
 0xaf3   : > { %v2929_v46 = vpack.c.bf16 %v2918_v16, %v2917_v51  ;;  %v2895_v39 = vadd.f32 %v3550_v26, %v2894_v55  ;;  %v2923_v22 = vmax.f32 %v2903_v19, 0.0 }
 0xaf4   : > { %v4191_v42 = vpop.f32.mrf.mxu0 }
 0xaf5   : > { %v2906_v61 = vadd.f32 %v4191_v42, %v3550_v26  ;;  %4204 = vmatprep.mubr.msk.bf16.mxu1 %vm962_vm0, %v2929_v46  ;;  %v2921_v12 = vmax.f32 %v2895_v39, 0.0 }
 0xaf6   : > { %v2897_v29 = vpop.f32.mrf.mxu0  ;;  %4205 = vmatmul.mubr.msk.bf16.gmra.mxu1 %vm962_vm0, %v2930_v18 }
 0xaf7   : > { %v2898_v52 = vadd.f32 %v3550_v26, %v2897_v29  ;;  %v2924_v15 = vmax.f32 %v2906_v61, 0.0  ;;  %v4335_v26 = vld [vmem:[%s5206_s9 + $0x38] sm:$0xff]  }
 0xaf8   : > { %4233 = vmatpush3.bf16.msra.mxu1 %v4335_v26 }
 0xaf9   : > { %v2922_v28 = vmax.f32 %v2898_v52, 0.0  ;;  %v2932_v25 = vpack.c.bf16 %v2924_v15, %v2923_v22  ;;  %4234 = vmatprep.subr.bf16.mxu1 %v4448_v63 }
 0xafb   : > { %v2931_v20 = vpack.c.bf16 %v2922_v28, %v2921_v12 }
 0xafc   : > { %4235 = vmatpush3.bf16.msra.mxu1 %v4336_v33 }
 0xafd   : > { %4208 = vmatprep.mubr.msk.bf16.mxu1 %vm962_vm0, %v2931_v20  ;;  %4236 = vmatprep.subr.bf16.mxu1 %v4448_v63 }
 0xafe   : > { %4209 = vmatmul.mubr.msk.bf16.gmra.mxu1 %vm962_vm0, %v2932_v25 }
 0xaff   : > { %4248 = vmatprep.mubr.msk.bf16.mxu1 %vm4449_vm1, %v4448_v63 }
 0xb00   : > { %4237 = vmatpush3.bf16.msra.mxu1 %v4337_v0 }
 0xb01   : > { %4238 = vmatprep.subr.bf16.mxu1 %v4448_v63 }
 0xb04   : > { %4239 = vmatpush3.bf16.msra.mxu1 %v4338_v1 }
 0xb05   : > { %4240 = vmatprep.subr.bf16.mxu1 %v4448_v63 }
 0xb08   : > { %4241 = vmatpush3.bf16.msra.mxu1 %v4339_v56 }
 0xb09   : > { %4242 = vmatprep.subr.bf16.mxu1 %v4448_v63 }
 0xba6   : > { %v4198_v2 = vpop.f32.mrf.mxu1 }
 0xba7   : > { %v3073_v47 = vadd.f32 %v4198_v2, %v5043_v41 }
 0xba8   : > { %v3008_v58 = vpop.f32.mrf.mxu1 }
 0xba9   : > { %v3071_v7 = vadd.f32 %v3008_v58, %v5046_v38 }
 0xbaa   : > { %v4199_v48 = vpop.f32.mrf.mxu1 }
 0xbab   : > { %v3074_v3 = vadd.f32 %v4199_v48, %v5049_v27 }
 0xbac   : > { %v3011_v53 = vpop.f32.mrf.mxu1 }
 0xbad   : > { %v3090_v4 = vpack.c.bf16 %v3074_v3, %v3073_v47  ;;  %v3072_v8 = vadd.f32 %v3011_v53, %v5052_v44 }
 0xbae   : > { %v4202_v23 = vpop.f32.mrf.mxu1 }
 0xbaf   : > { %v3089_v5 = vpack.c.bf16 %v3072_v8, %v3071_v7  ;;  %v3077_v60 = vadd.f32 %v4202_v23, %v5055_v62  ;;  %v1456_v62 = vadd.f32 %v4815_v10, %v4776_v6 }
 0xbb0   : > { %v3024_v9 = vpop.f32.mrf.mxu1 }
 0xbb1   : > { %v3075_v34 = vadd.f32 %v3024_v9, %v5058_v31 }
 0xbb2   : > { %v4203_v49 = vpop.f32.mrf.mxu1 }
 0xbb3   : > { %v3078_v24 = vadd.f32 %v4203_v49, %v5061_v35 }
 0xbb4   : > { %v3027_v30 = vpop.f32.mrf.mxu1 }
 0xbb5   : > { %v3092_v41 = vpack.c.bf16 %v3078_v24, %v3077_v60  ;;  %v3076_v27 = vadd.f32 %v3027_v30, %v5064_v32  ;;  %v1869_v32 = vadd.f32 %v4914_v13, %v1456_v62  ;;  %v4334_v13 = vld [vmem:[%s554_s30] sm:$0xff]  }
 0xbb6   : > { %v4206_v14 = vpop.f32.mrf.mxu1 }
 0xbb7   : > { %v3091_v40 = vpack.c.bf16 %v3076_v27, %v3075_v34  ;;  %v3081_v44 = vadd.f32 %v4206_v14, %v5067_v43  ;;  %v2274_v42 = vadd.f32 %v5020_v36, %v1869_v32  ;;  %v4340_v36 = vld [vmem:[%s5206_s9 + $0x10] sm:$0xff]  }
 0xbb8   : > { %v3040_v38 = vpop.f32.mrf.mxu1  ;;  %4243 = vmatpush3.bf16.msra.mxu1 %v4340_v36 }
 0xbb9   : > { %v3079_v35 = vadd.f32 %v3040_v38, %v5070_v37  ;;  %v2679_v43 = vadd.f32 %v5094_v17, %v2274_v42  ;;  %4244 = vmatprep.subr.bf16.mxu1 %v4448_v63 }
 0xbba   : > { %v4207_v50 = vpop.f32.mrf.mxu1 }
 0xbbb   : > { %v3082_v51 = vadd.f32 %v4207_v50, %v5073_v45 }
 0xbbc   : > { %v3043_v16 = vpop.f32.mrf.mxu1 }
 0xbbd   : > { %v3094_v54 = vpack.c.bf16 %v3082_v51, %v3081_v44  ;;  %v3080_v31 = vadd.f32 %v3043_v16, %v5076_v21 }
 0xbbe   : > { %v4210_v55 = vpop.f32.mrf.mxu1 }
 0xbbf   : > { %v3093_v46 = vpack.c.bf16 %v3080_v31, %v3079_v35  ;;  %v3085_v45 = vadd.f32 %v4210_v55, %v5079_v57  ;;  %v4341_v57 = vld [vmem:[%s5206_s9 + $0x8] sm:$0xff]  }
 0xbc0   : > { %v3056_v18 = vpop.f32.mrf.mxu1  ;;  %4245 = vmatpush3.bf16.msra.mxu1 %v4341_v57 }
 0xbc1   : > { %v3083_v10 = vadd.f32 %v3056_v18, %v5082_v11  ;;  %4246 = vmatprep.subr.bf16.mxu1 %v4448_v63  ;;  %v4342_v11 = vld [vmem:[%s5206_s9] sm:$0xff]  }
 0xbc2   : > { %v4211_v39 = vpop.f32.mrf.mxu1 }
 0xbc3   : > { %v3086_v61 = vadd.f32 %v4211_v39, %v5085_v59  ;;  %v3561_v59 = vld [vmem:[%s5205_s8] ss:$0 sm:$0xff] }
 0xbc4   : > { %v3059_v6 = vpop.f32.mrf.mxu1  ;;  %4247 = vmatpush3.bf16.msra.mxu1 %v4342_v11 }
 0xbc5   : > { %v3096_v37 = vpack.c.bf16 %v3086_v61, %v3085_v45  ;;  %v3084_v19 = vadd.f32 %v3059_v6, %v2679_v43 }
 0xbc7   : > { %v3095_v21 = vpack.c.bf16 %v3084_v19, %v3083_v10  ;;  %4213 = vmatpush3.bf16.msra.mxu0 %v3096_v37 }
 0xbc8   : > { %4214 = vmatprep.subr.bf16.mxu0 %v4448_v63 }
 0xbcb   : > { %4215 = vmatpush3.bf16.msra.mxu0 %v3095_v21 }
 0xbcc   : > { %4216 = vmatprep.subr.bf16.mxu0 %v4448_v63 }
 0xbcf   : > { %4217 = vmatpush3.bf16.msra.mxu0 %v3094_v54 }
 0xbd0   : > { %4218 = vmatprep.subr.bf16.mxu0 %v4448_v63 }
 0xbd3   : > { %4219 = vmatpush3.bf16.msra.mxu0 %v3093_v46 }
 0xbd4   : > { %4220 = vmatprep.subr.bf16.mxu0 %v4448_v63 }
 0xbd7   : > { %4221 = vmatpush3.bf16.msra.mxu0 %v3092_v41 }
 0xbd8   : > { %4222 = vmatprep.subr.bf16.mxu0 %v4448_v63 }
 0xbdb   : > { %4223 = vmatpush3.bf16.msra.mxu0 %v3091_v40 }
 0xbdc   : > { %4224 = vmatprep.subr.bf16.mxu0 %v4448_v63 }
 0xbdf   : > { %4225 = vmatpush3.bf16.msra.mxu0 %v3090_v4 }
 0xbe0   : > { %4226 = vmatprep.subr.bf16.mxu0 %v4448_v63  ;;  %v3563_v63 = vld [vmem:[%s5207_s10] ss:$0 sm:$0xff] }
 0xbe3   : > { %4227 = vmatpush3.bf16.msra.mxu0 %v3089_v5 }
 0xbe6   : > { %4229 = vmatmul.mubr.bf16.vlgmr.msra.gmra.mxu0 %v4334_v13 }
 0xca6   : > { %v3144_v17 = vpop.f32.mrf.mxu0 }
 0xca7   : > { %v3145_v52 = vadd.f32 %v3561_v59, %v3144_v17 }
 0xca8   : > { %v4230_v29 = vpop.f32.mrf.mxu0 }
 0xca9   : > { %v3151_v22 = vmax.f32 %v3145_v52, 0.0 }
 0xcaa   : > { %v3147_v15 = vpop.f32.mrf.mxu0 }
 0xcab   : > { %v3148_v12 = vadd.f32 %v3561_v59, %v3147_v15 }
 0xcac   : > { %v4231_v28 = vpop.f32.mrf.mxu0 }
 0xcad   : > { %v3152_v20 = vmax.f32 %v3148_v12, 0.0 }
 0xcaf   : > { %v3153_v25 = vpack.c.bf16 %v3152_v20, %v3151_v22 }
 0xcb1   : > { %4249 = vmatmul.mubr.bf16.vlgmr.msra.gmra.mxu1 %v3153_v25 }
 0xd71   : > { %v3259_v26 = vpop.f32.mrf.mxu1 }
 0xd72   : > { %v3260_v33 = vadd.f32 %v3563_v63, %v3259_v26 }
 0xd73   : > { %v4250_v0 = vpop.f32.mrf.mxu1 }
 0xd74   : > { %v3267_v1 = vsel %vm3266_vm2, %v3260_v33, -inf }
 0xd75   : > { %3268 = vmax.xlane.f32.xlu0 %v3267_v1  ;;  %v3262_v56 = vpop.f32.mrf.mxu1 }
 0xd76   : > { %v3263_v2 = vadd.f32 %v3563_v63, %v3262_v56 }
 0xd77   : > { %v4251_v58 = vpop.f32.mrf.mxu1 }
 0xd78   : > { %v3270_v48 = vsel %vm3266_vm2, %v3263_v2, -inf }
 0xd79   : > { %3271 = vmax.xlane.f32.xlu1 %v3270_v48 }
 0xdfe   : > { %v3269_v47 = vpop.xlane.xlu0 %3268 }
 0xdff   : > { %v3273_v3 = vsub.f32 %v3260_v33, %v3269_v47 }
 0xe01   : > { %v3275_v53 = vmul.f32 1.442695, %v3273_v3 }
 0xe02   : > { %v3272_v7 = vpop.xlane.xlu1 %3271 }
 0xe03   : > { %4343 = vpow2.f32 %v3275_v53  ;;  %v3274_v4 = vsub.f32 %v3263_v2, %v3272_v7 }
 0xe05   : > { %v3277_v8 = vmul.f32 1.442695, %v3274_v4 }
 0xe07   : > { %4345 = vpow2.f32 %v3277_v8 }
 0xe10   : > { %v4344_v23 = vpop.eup %4343 }
 0xe11   : > { %v3279_v5 = vsel %vm3266_vm2, %v4344_v23, 0.0 }
 0xe12   : > { %3280 = vadd.xlane.f32.xlu0 %v3279_v5 }
 0xe14   : > { %v4346_v9 = vpop.eup %4345 }
 0xe15   : > { %v3282_v49 = vsel %vm3266_vm2, %v4346_v9, 0.0 }
 0xe16   : > { %3283 = vadd.xlane.f32.xlu0 %v3282_v49 }
 0xe9b   : > { %v3281_v60 = vpop.xlane.xlu0 %3280 }
 0xe9c   : > { %4347 = vrcp.f32 %v3281_v60 }
 0xe9f   : > { %v3284_v24 = vpop.xlane.xlu0 %3283 }
 0xea0   : > { %4349 = vrcp.f32 %v3284_v24 }
 0xea9   : > { %v4348_v30 = vpop.eup %4347 }
 0xeaa   : > { %v3287_v34 = vmul.f32 %v4348_v30, %v4344_v23 }
 0xeac   : > { %3289 = vst.msk [vmem:[%s620_s25] sm:$0xff] %vm3266_vm2, %v3287_v34 }
 0xead   : > { %v4350_v41 = vpop.eup %4349 }
 0xeae   : > { %v3288_v27 = vmul.f32 %v4350_v41, %v4346_v9 }
 0xeb0   : > { %3290 = vst.msk [vmem:[%s620_s25 + $0x8] sm:$0xff] %vm3266_vm2, %v3288_v27 }
 0xeb1 PF: > { %s5215_s20 = sld [smem:[#allocation10_spill]]  ;;  %p20_p7 = scmp.ge.s32.totalorder %s4529_s21, 4  }
 0xeb2   : > { %s5216_s17 = smov %s4437_s18  ;;  %s5218_s19 = smov %s4529_s21 }
 0xeb3   :  { %22 = sbr.rel (!%p20_p7) target bundleno = 5 (0x5), region = 214 }
 0xeb7   : > { %s5217_s18 = smov %s5215_s20 }
 0xeb8   :  { %3313 = vsyncpa [#allocation5], 1 }
 0xeb9   :  { %3315 = vsyncpa [#allocation5 + $0x1], 1 }
 0xeba   :  { %3316 = vsyncpa [#allocation7], 1 }

</bundles_post_ra>
